<compile_context>
chip_gen: v5e
topology: v5e:2x2
jax: 0.10.0
libtpu: 0.0.40
codegen_flags: <defaults>
</compile_context>

<pallas_src>
import jax
import jax.numpy as jnp
from jax.experimental import pallas as pl
from jax.experimental.pallas import tpu as pltpu


def se_kernel(x_ref, w1t_ref, w2t_ref, o_ref):
    # x_ref / o_ref: (bblk, C, HW) in the input dtype (native NCHW, HW on lanes)
    # w1t_ref: (C, hidden)   w2t_ref: (hidden, C)   (PyTorch weights, pre-transposed)
    x = x_ref[...]

    # Squeeze: AdaptiveAvgPool2d(1) == mean over HW (cross-lane/XLU reduce, f32 accum;
    # no full-tile f32 copy of x is materialized).
    pooled = jnp.mean(x, axis=-1, dtype=jnp.float32)                        # (bblk, C)

    # Excitation, batched over the block: Linear -> ReLU -> Linear -> Sigmoid (bias=False).
    y1 = jnp.dot(pooled, w1t_ref[...], preferred_element_type=jnp.float32)  # (bblk, hidden)
    y1 = jnp.maximum(y1, 0.0)
    y2 = jnp.dot(y1, w2t_ref[...], preferred_element_type=jnp.float32)      # (bblk, C)
    scale = jax.nn.sigmoid(y2)                                               # (bblk, C)

    # Rescale: per-(b, c) gate broadcast across the HW (lane) axis; multiply in
    # the input dtype so the streaming path stays bf16-friendly.
    o_ref[...] = x * scale.astype(o_ref.dtype)[:, :, None]


def _pick_bblk(batch, bytes_per_example, *, target_block_bytes, min_steps=4,
               min_block_bytes=512 << 10):
    """Batch block size: ~target_block_bytes per block, prefer >= min_steps grid steps."""
    bblk = int(max(1, min(batch, target_block_bytes // max(1, bytes_per_example))))
    # Prefer several grid steps (pipeline forms; both v7x TCs get work), but never
    # shrink a block below ~512 KiB where per-step overhead would dominate.
    while (bblk > 1
           and pl.cdiv(batch, bblk) < min_steps
           and (bblk // 2) * bytes_per_example >= min_block_bytes):
        bblk //= 2
    return bblk


def se_module_forward(x, w1, w2, *, target_block_bytes=4 << 20):
    """x: (B, C, H, W); w1: (C//r, C); w2: (C, C//r). Returns (B, C, H, W)."""
    B, C, H, W = x.shape
    HW = H * W
    hidden = w1.shape[0]

    # Free (metadata-only) reshape: NCHW stays native, HW becomes the lane axis.
    x_flat = x.reshape(B, C, HW)
    w1t = jnp.transpose(w1)                                           # (C, hidden)
    w2t = jnp.transpose(w2)                                           # (hidden, C)

    bytes_per_example = HW * C * x.dtype.itemsize
    bblk = _pick_bblk(B, bytes_per_example, target_block_bytes=target_block_bytes)
    grid = (pl.cdiv(B, bblk),)

    # Residency: 2 input + 2 output buffers of one block (default double buffering)
    # + tiny weights.  Clamp to [32, 48] MiB (safe on v5e/v6e 128 MiB and v7x 64 MiB).
    block_bytes = bblk * bytes_per_example
    weight_bytes = 2 * C * hidden * w1.dtype.itemsize
    needed = 4 * block_bytes + 4 * weight_bytes + (2 << 20)
    vmem_limit = int(min(48 << 20, max(32 << 20, needed)))
    # TODO(synk): if a single example (C*HW) ever exceeds ~10 MiB, split HW across
    # grid steps with a two-pass (pool, then rescale) variant instead.

    out_flat = pl.pallas_call(
        se_kernel,
        out_shape=jax.ShapeDtypeStruct((B, C, HW), x.dtype),
        grid_spec=pltpu.PrefetchScalarGridSpec(
            num_scalar_prefetch=0,
            grid=grid,
            in_specs=[
                # Streaming input block (default double buffering).
                pl.BlockSpec((bblk, C, HW), lambda b: (b, 0, 0)),
                # Tiny weights, VMEM-resident across the whole grid.
                pl.BlockSpec((C, hidden), lambda b: (0, 0)),
                pl.BlockSpec((hidden, C), lambda b: (0, 0)),
            ],
            out_specs=pl.BlockSpec((bblk, C, HW), lambda b: (b, 0, 0)),
        ),
        compiler_params=pltpu.CompilerParams(
            dimension_semantics=("parallel",),
            vmem_limit_bytes=vmem_limit,
        ),
    )(x_flat, w1t, w2t)

    return out_flat.reshape(B, C, H, W)


def se_reference(x, w1, w2):
    """Pure-JAX reference mirroring the PyTorch forward exactly."""
    y = jnp.mean(x, axis=(2, 3))                    # (B, C)
    y = jnp.maximum(y @ w1.T, 0.0)                  # (B, hidden)
    y = jax.nn.sigmoid(y @ w2.T)                    # (B, C)
    return x * y[:, :, None, None]


if __name__ == "__main__":
    # Small but layout-realistic shapes: in_channels=128, reduction=16 -> hidden=8,
    # HW = 16*16 = 256 (lane-dense).
    B, C, H, W = 4, 128, 16, 16
    reduction = 16
    hidden = C // reduction

    key = jax.random.PRNGKey(0)
    kx, k1, k2 = jax.random.split(key, 3)

    x = jax.random.normal(kx, (B, C, H, W), dtype=jnp.float32)
    # nn.Linear weight shapes (out_features, in_features), bias=False per the module.
    w1 = jax.random.normal(k1, (hidden, C), dtype=jnp.float32) * 0.1
    w2 = jax.random.normal(k2, (C, hidden), dtype=jnp.float32) * 0.1

    out = jax.block_until_ready(se_module_forward(x, w1, w2))
    ref = jax.block_until_ready(se_reference(x, w1, w2))

    assert out.shape == (B, C, H, W)
    assert jnp.allclose(out, ref, atol=1e-5, rtol=1e-5)
    print("KERNEL_OK")
</pallas_src>

<mosaic_0001>
module attributes {stable_mosaic.version = 11 : i64} {
  func.func @se_kernel(%arg0: i32, %arg1: memref<4x128x256xf32, #tpu.memory_space<vmem>>, %arg2: memref<128x8xf32, #tpu.memory_space<vmem>>, %arg3: memref<8x128xf32, #tpu.memory_space<vmem>>, %arg4: memref<4x128x256xf32, #tpu.memory_space<vmem>>) attributes {dimension_semantics = [#tpu.dimension_semantics<parallel>], iteration_bounds = array<i64: 1>, scalar_prefetch = 0 : i64, scratch_operands = 0 : i64, tpu.core_type = #tpu.core_type<tc>, window_params = [{transform_indices = @transform_0, window_bounds = array<i64: 4, 128, 256>}, {pipeline_mode = #tpu.pipeline_mode<synchronous>, transform_indices = @transform_1, window_bounds = array<i64: 128, 8>}, {pipeline_mode = #tpu.pipeline_mode<synchronous>, transform_indices = @transform_2, window_bounds = array<i64: 8, 128>}, {transform_indices = @transform_3, window_bounds = array<i64: 4, 128, 256>}]} {
    %c0 = arith.constant 0 : index
    %c0_0 = arith.constant 0 : index
    %c0_1 = arith.constant 0 : index
    %0 = vector.load %arg1[%c0, %c0_0, %c0_1] : memref<4x128x256xf32, #tpu.memory_space<vmem>>, vector<4x128x256xf32>
    %cst = arith.constant dense<0.000000e+00> : vector<4x128xf32>
    %1 = vector.multi_reduction <add>, %0, %cst [2] : vector<4x128x256xf32> to vector<4x128xf32>
    %cst_2 = arith.constant 2.560000e+02 : f32
    %2 = vector.broadcast %cst_2 : f32 to vector<4x128xf32>
    %3 = arith.divf %1, %2 : vector<4x128xf32>
    %c0_3 = arith.constant 0 : index
    %c0_4 = arith.constant 0 : index
    %4 = vector.load %arg2[%c0_3, %c0_4] : memref<128x8xf32, #tpu.memory_space<vmem>>, vector<128x8xf32>
    %cst_5 = arith.constant dense<0.000000e+00> : vector<4x8xf32>
    %5 = tpu.matmul %3, %4, %cst_5 {dimension_numbers = #tpu.dot_dimension_numbers<[1], [0], [0], [1], [0, 0, 1, 1], [], []>} : vector<4x128xf32>, vector<128x8xf32>, vector<4x8xf32> -> vector<4x8xf32>
    %cst_6 = arith.constant 0.000000e+00 : f32
    %6 = vector.broadcast %cst_6 : f32 to vector<4x8xf32>
    %7 = arith.maximumf %5, %6 : vector<4x8xf32>
    %c0_7 = arith.constant 0 : index
    %c0_8 = arith.constant 0 : index
    %8 = vector.load %arg3[%c0_7, %c0_8] : memref<8x128xf32, #tpu.memory_space<vmem>>, vector<8x128xf32>
    %cst_9 = arith.constant dense<0.000000e+00> : vector<4x128xf32>
    %9 = tpu.matmul %7, %8, %cst_9 {dimension_numbers = #tpu.dot_dimension_numbers<[1], [0], [0], [1], [0, 0, 1, 1], [], []>} : vector<4x8xf32>, vector<8x128xf32>, vector<4x128xf32> -> vector<4x128xf32>
    %10 = arith.negf %9 : vector<4x128xf32>
    %11 = math.exp %10 : vector<4x128xf32>
    %cst_10 = arith.constant 1.000000e+00 : f32
    %12 = vector.broadcast %cst_10 : f32 to vector<4x128xf32>
    %13 = arith.addf %12, %11 : vector<4x128xf32>
    %14 = arith.divf %12, %13 : vector<4x128xf32>
    %15 = vector.shape_cast %14 : vector<4x128xf32> to vector<4x128x1xf32>
    %16 = vector.broadcast %15 : vector<4x128x1xf32> to vector<4x128x256xf32>
    %17 = arith.mulf %0, %16 : vector<4x128x256xf32>
    %c0_11 = arith.constant 0 : index
    %c0_12 = arith.constant 0 : index
    %c0_13 = arith.constant 0 : index
    %18 = vector.load %arg4[%c0_11, %c0_12, %c0_13] : memref<4x128x256xf32, #tpu.memory_space<vmem>>, vector<4x128x256xf32>
    tpu.vector_store %arg4[%c0_11, %c0_12, %c0_13], %17 {strides = array<i32>} : memref<4x128x256xf32, #tpu.memory_space<vmem>>, vector<4x128x256xf32>,
    return
  }
  func.func @transform_0(%arg0: i32) -> (i32, i32, i32) {
    %c0_i32 = arith.constant 0 : i32
    %c0_i32_0 = arith.constant 0 : i32
    %c0_i32_1 = arith.constant 0 : i32
    return %arg0, %c0_i32, %c0_i32_0 : i32, i32, i32
  }
  func.func @transform_1(%arg0: i32) -> (i32, i32) {
    %c0_i32 = arith.constant 0 : i32
    %c0_i32_0 = arith.constant 0 : i32
    %c0_i32_1 = arith.constant 0 : i32
    return %c0_i32, %c0_i32_0 : i32, i32
  }
  func.func @transform_2(%arg0: i32) -> (i32, i32) {
    %c0_i32 = arith.constant 0 : i32
    %c0_i32_0 = arith.constant 0 : i32
    %c0_i32_1 = arith.constant 0 : i32
    return %c0_i32, %c0_i32_0 : i32, i32
  }
  func.func @transform_3(%arg0: i32) -> (i32, i32, i32) {
    %c0_i32 = arith.constant 0 : i32
    %c0_i32_0 = arith.constant 0 : i32
    %c0_i32_1 = arith.constant 0 : i32
    return %arg0, %c0_i32, %c0_i32_0 : i32, i32, i32
  }
}

</mosaic_0001>

<bundles_post_ra>
// kernel: tpu_custom_call.1
= control target key start
LH: loop header
LB: loop body
LE: loop exit
PB: predicated region body
PF: predicated region fallthrough
CT: control target
= control target key end

     0   :  { %8 = vsyncpa [#allocation3], 0  ;;  %s2159_s0 = inlined_call_operand.hbm [shape: f32[4,128,256], index: 0, kind: input, shape index: {}]   ;;  %s2160_s1 = inlined_call_operand.vmem [shape: f32[128,8], index: 1, kind: input, shape index: {}]   ;;  %s2161_s2 = inlined_call_operand.vmem [shape: f32[8,128], index: 2, kind: input, shape index: {}]   ;;  %s2162_s3 = inlined_call_operand.hbm [shape: f32[4,128,256], index: 3, kind: output, shape index: {}]  }
   0x1   :  { %9 = vsyncpa [#allocation4], 0  ;;  %s14_s14 = sshll.u32 %s2159_s0, 4  ;;  %s1651_s15 = smov [#allocation2]   ;;  %s15_s14 = int_to_ptr.hbm [resolvable:$true] %s14_s14 }
   0x2   :  { %s16_s16 = sshll.u32 %s1651_s15, 4  ;;  %s1652_s17 = smov 256   ;;  %s17_s16 = int_to_ptr.vmem [resolvable:$true] %s16_s16 }
   0x3   :  { %s1653_s18 = smov 16  }
   0x4   :  { %22 = dma.hbm_to_vmem [thread:$0]  %s15_s14, 16384, %s17_s16, [#allocation3], %s1652_s17, %s1652_s17, %s1653_s18  }
   0x5   :  { %1647 = dma.done.wait [#allocation3], 16384  }
   0x6   :  { %1648 = vsyncadd [#allocation3], 4294950912  ;;  %v35_v0 = vld [vmem:[#allocation2 + $0x20] sm:$0xff]  ;;  %v36_v1 = vld [vmem:[#allocation2 + $0x28] sm:$0xff]  ;;  %vm507_vm1 = vcmask 130112   ;;  %vm511_vm2 = vcmask 195712  }
   0x7   :  { %v31_v2 = vld [vmem:[#allocation2] sm:$0xff]  ;;  %v165_v3 = vadd.f32 %v36_v1, %v35_v0  ;;  %v32_v4 = vld [vmem:[#allocation2 + $0x8] sm:$0xff]  ;;  %v37_v9 = vld [vmem:[#allocation2 + $0x30] sm:$0xff]  ;;  %vm515_vm3 = vcmask 261312   ;;  %vm519_vm4 = vcmask 326912   ;;  %vm523_vm5 = vcmask 392512  }
   0x8   :  { %v39_v5 = vld [vmem:[#allocation2 + $0x40] sm:$0xff]  ;;  %v40_v6 = vld [vmem:[#allocation2 + $0x48] sm:$0xff]  ;;  %v159_v7 = vadd.f32 %v32_v4, %v31_v2  ;;  %v38_v10 = vld [vmem:[#allocation2 + $0x38] sm:$0xff]  ;;  %vm527_vm6 = vcmask 458112   ;;  %vm531_vm7 = vcmask 523712   ;;  %vm535_vm8 = vcmask 589312  }
   0x9   :  { %v171_v8 = vadd.f32 %v40_v6, %v39_v5  ;;  %166 = vadd.xlane.f32.xlu1 %v165_v3  ;;  %v33_v11 = vld [vmem:[#allocation2 + $0x10] sm:$0xff]  ;;  %v34_v12 = vld [vmem:[#allocation2 + $0x18] sm:$0xff]  ;;  %v168_v15 = vadd.f32 %v38_v10, %v37_v9  ;;  %v43_v20 = vld [vmem:[#allocation2 + $0x60] sm:$0xff]  ;;  %vm539_vm9 = vcmask 654912   ;;  %vm543_vm10 = vcmask 720512   ;;  %s1380_s28 = sshll.u32 %s2162_s3, 4  ;;  %s1381_s28 = int_to_ptr.hbm [resolvable:$true] %s1380_s28 }
   0xa   :  { %160 = vadd.xlane.f32.xlu0 %v159_v7  ;;  %v41_v13 = vld [vmem:[#allocation2 + $0x50] sm:$0xff]  ;;  %v42_v14 = vld [vmem:[#allocation2 + $0x58] sm:$0xff]  ;;  %v162_v16 = vadd.f32 %v34_v12, %v33_v11  ;;  %v44_v21 = vld [vmem:[#allocation2 + $0x68] sm:$0xff]  ;;  %vm547_vm11 = vcmask 786112   ;;  %vm551_vm12 = vcmask 851712   ;;  %vm555_vm13 = vcmask 917312  }
   0xb   :  { %172 = vadd.xlane.f32.xlu2 %v171_v8  ;;  %v174_v17 = vadd.f32 %v42_v14, %v41_v13  ;;  %v45_v18 = vld [vmem:[#allocation2 + $0x70] sm:$0xff]  ;;  %v46_v19 = vld [vmem:[#allocation2 + $0x78] sm:$0xff]  ;;  %v47_v22 = vld [vmem:[#allocation2 + $0x80] sm:$0xff]  ;;  %v177_v25 = vadd.f32 %v44_v21, %v43_v20  ;;  %vm559_vm14 = vcmask 982912   ;;  %vm563_vm15 = vcmask 1048512  }
   0xc   :  { %v48_v23 = vld [vmem:[#allocation2 + $0x88] sm:$0xff]  ;;  %v180_v24 = vadd.f32 %v46_v19, %v45_v18  ;;  %v51_v27 = vld [vmem:[#allocation2 + $0xa0] sm:$0xff]  ;;  %v49_v29 = vld [vmem:[#allocation2 + $0x90] sm:$0xff] }
   0xd   :  { %v183_v26 = vadd.f32 %v48_v23, %v47_v22  ;;  %v52_v28 = vld [vmem:[#allocation2 + $0xa8] sm:$0xff]  ;;  %v50_v30 = vld [vmem:[#allocation2 + $0x98] sm:$0xff]  ;;  %v53_v31 = vld [vmem:[#allocation2 + $0xb0] sm:$0xff] }
   0xe   :  { %v54_v32 = vld [vmem:[#allocation2 + $0xb8] sm:$0xff]  ;;  %v189_v33 = vadd.f32 %v52_v28, %v51_v27  ;;  %v186_v34 = vadd.f32 %v50_v30, %v49_v29  ;;  %v57_v36 = vld [vmem:[#allocation2 + $0xd0] sm:$0xff]  ;;  %v55_v38 = vld [vmem:[#allocation2 + $0xc0] sm:$0xff] }
   0xf   :  { %v192_v35 = vadd.f32 %v54_v32, %v53_v31  ;;  %v58_v37 = vld [vmem:[#allocation2 + $0xd8] sm:$0xff]  ;;  %v56_v39 = vld [vmem:[#allocation2 + $0xc8] sm:$0xff]  ;;  %v59_v40 = vld [vmem:[#allocation2 + $0xe0] sm:$0xff] }
  0x10   :  { %v60_v41 = vld [vmem:[#allocation2 + $0xe8] sm:$0xff]  ;;  %v198_v42 = vadd.f32 %v58_v37, %v57_v36  ;;  %v195_v43 = vadd.f32 %v56_v39, %v55_v38  ;;  %v63_v45 = vld [vmem:[#allocation2 + $0x100] sm:$0xff]  ;;  %v61_v47 = vld [vmem:[#allocation2 + $0xf0] sm:$0xff] }
  0x11   :  { %169 = vadd.xlane.f32.xlu1 %v168_v15  ;;  %v201_v44 = vadd.f32 %v60_v41, %v59_v40  ;;  %v64_v46 = vld [vmem:[#allocation2 + $0x108] sm:$0xff]  ;;  %v62_v48 = vld [vmem:[#allocation2 + $0xf8] sm:$0xff]  ;;  %v65_v49 = vld [vmem:[#allocation2 + $0x110] sm:$0xff] }
  0x12   :  { %163 = vadd.xlane.f32.xlu0 %v162_v16  ;;  %v66_v50 = vld [vmem:[#allocation2 + $0x118] sm:$0xff]  ;;  %v207_v51 = vadd.f32 %v64_v46, %v63_v45  ;;  %v204_v52 = vadd.f32 %v62_v48, %v61_v47  ;;  %v69_v54 = vld [vmem:[#allocation2 + $0x130] sm:$0xff]  ;;  %v67_v56 = vld [vmem:[#allocation2 + $0x120] sm:$0xff] }
  0x13   :  { %175 = vadd.xlane.f32.xlu2 %v174_v17  ;;  %v210_v53 = vadd.f32 %v66_v50, %v65_v49  ;;  %v70_v55 = vld [vmem:[#allocation2 + $0x138] sm:$0xff]  ;;  %v68_v57 = vld [vmem:[#allocation2 + $0x128] sm:$0xff]  ;;  %v71_v58 = vld [vmem:[#allocation2 + $0x140] sm:$0xff] }
  0x14   :  { %v72_v59 = vld [vmem:[#allocation2 + $0x148] sm:$0xff]  ;;  %v216_v60 = vadd.f32 %v70_v55, %v69_v54  ;;  %v213_v61 = vadd.f32 %v68_v57, %v67_v56  ;;  %v75_v63 = vld [vmem:[#allocation2 + $0x160] sm:$0xff]  ;;  %v73_v1 = vld [vmem:[#allocation2 + $0x150] sm:$0xff] }
  0x15   :  { %v219_v62 = vadd.f32 %v72_v59, %v71_v58  ;;  %v76_v0 = vld [vmem:[#allocation2 + $0x168] sm:$0xff]  ;;  %v74_v2 = vld [vmem:[#allocation2 + $0x158] sm:$0xff]  ;;  %v77_v3 = vld [vmem:[#allocation2 + $0x170] sm:$0xff] }
  0x16   :  { %v78_v4 = vld [vmem:[#allocation2 + $0x178] sm:$0xff]  ;;  %v225_v5 = vadd.f32 %v76_v0, %v75_v63  ;;  %v222_v6 = vadd.f32 %v74_v2, %v73_v1  ;;  %v81_v8 = vld [vmem:[#allocation2 + $0x190] sm:$0xff]  ;;  %v79_v10 = vld [vmem:[#allocation2 + $0x180] sm:$0xff] }
  0x17   :  { %v228_v7 = vadd.f32 %v78_v4, %v77_v3  ;;  %v82_v9 = vld [vmem:[#allocation2 + $0x198] sm:$0xff]  ;;  %v80_v11 = vld [vmem:[#allocation2 + $0x188] sm:$0xff]  ;;  %v83_v12 = vld [vmem:[#allocation2 + $0x1a0] sm:$0xff] }
  0x18   :  { %v84_v13 = vld [vmem:[#allocation2 + $0x1a8] sm:$0xff]  ;;  %v234_v14 = vadd.f32 %v82_v9, %v81_v8  ;;  %v231_v15 = vadd.f32 %v80_v11, %v79_v10  ;;  %v87_v17 = vld [vmem:[#allocation2 + $0x1c0] sm:$0xff]  ;;  %v85_v19 = vld [vmem:[#allocation2 + $0x1b0] sm:$0xff] }
  0x19   :  { %181 = vadd.xlane.f32.xlu1 %v180_v24  ;;  %v237_v16 = vadd.f32 %v84_v13, %v83_v12  ;;  %v88_v18 = vld [vmem:[#allocation2 + $0x1c8] sm:$0xff]  ;;  %v86_v20 = vld [vmem:[#allocation2 + $0x1b8] sm:$0xff]  ;;  %v89_v21 = vld [vmem:[#allocation2 + $0x1d0] sm:$0xff] }
  0x1a   :  { %178 = vadd.xlane.f32.xlu0 %v177_v25  ;;  %v90_v22 = vld [vmem:[#allocation2 + $0x1d8] sm:$0xff]  ;;  %v243_v23 = vadd.f32 %v88_v18, %v87_v17  ;;  %v240_v24 = vadd.f32 %v86_v20, %v85_v19  ;;  %v91_v28 = vld [vmem:[#allocation2 + $0x1e0] sm:$0xff]  ;;  %v92_v29 = vld [vmem:[#allocation2 + $0x1e8] sm:$0xff] }
  0x1b   :  { %184 = vadd.xlane.f32.xlu2 %v183_v26  ;;  %v246_v25 = vadd.f32 %v90_v22, %v89_v21  ;;  %v93_v26 = vld [vmem:[#allocation2 + $0x1f0] sm:$0xff]  ;;  %v94_v27 = vld [vmem:[#allocation2 + $0x1f8] sm:$0xff]  ;;  %v95_v30 = vld [vmem:[#allocation2 + $0x200] sm:$0xff] }
  0x1c   :  { %v96_v31 = vld [vmem:[#allocation2 + $0x208] sm:$0xff]  ;;  %v252_v32 = vadd.f32 %v94_v27, %v93_v26  ;;  %v97_v37 = vld [vmem:[#allocation2 + $0x210] sm:$0xff]  ;;  %v98_v38 = vld [vmem:[#allocation2 + $0x218] sm:$0xff] }
  0x1d   :  { %v100_v36 = vld [vmem:[#allocation2 + $0x228] sm:$0xff]  ;;  %v101_v39 = vld [vmem:[#allocation2 + $0x230] sm:$0xff]  ;;  %v102_v40 = vld [vmem:[#allocation2 + $0x238] sm:$0xff] }
  0x1e   :  { %v106_v45 = vld [vmem:[#allocation2 + $0x258] sm:$0xff]  ;;  %v103_v46 = vld [vmem:[#allocation2 + $0x240] sm:$0xff]  ;;  %v104_v47 = vld [vmem:[#allocation2 + $0x248] sm:$0xff] }
  0x1f   :  { %v107_v48 = vld [vmem:[#allocation2 + $0x260] sm:$0xff]  ;;  %v108_v49 = vld [vmem:[#allocation2 + $0x268] sm:$0xff]  ;;  %v109_v56 = vld [vmem:[#allocation2 + $0x270] sm:$0xff] }
  0x20   :  { %v111_v54 = vld [vmem:[#allocation2 + $0x280] sm:$0xff]  ;;  %v112_v55 = vld [vmem:[#allocation2 + $0x288] sm:$0xff]  ;;  %v110_v57 = vld [vmem:[#allocation2 + $0x278] sm:$0xff] }
  0x21   :  { %190 = vadd.xlane.f32.xlu1 %v189_v33  ;;  %v249_v33 = vadd.f32 %v92_v29, %v91_v28  ;;  %v113_v58 = vld [vmem:[#allocation2 + $0x290] sm:$0xff]  ;;  %v114_v59 = vld [vmem:[#allocation2 + $0x298] sm:$0xff]  ;;  %v115_v3 = vld [vmem:[#allocation2 + $0x2a0] sm:$0xff] }
  0x22   :  { %187 = vadd.xlane.f32.xlu0 %v186_v34  ;;  %v255_v34 = vadd.f32 %v96_v31, %v95_v30  ;;  %v282_v63 = vadd.f32 %v114_v59, %v113_v58  ;;  %v117_v1 = vld [vmem:[#allocation2 + $0x2b0] sm:$0xff]  ;;  %v118_v2 = vld [vmem:[#allocation2 + $0x2b8] sm:$0xff]  ;;  %v116_v4 = vld [vmem:[#allocation2 + $0x2a8] sm:$0xff] }
  0x23   :  { %193 = vadd.xlane.f32.xlu2 %v192_v35  ;;  %v99_v35 = vld [vmem:[#allocation2 + $0x220] sm:$0xff]  ;;  %v285_v9 = vadd.f32 %v116_v4, %v115_v3  ;;  %v124_v13 = vld [vmem:[#allocation2 + $0x2e8] sm:$0xff]  ;;  %v126_v17 = vld [vmem:[#allocation2 + $0x2f8] sm:$0xff] }
  0x24   :  { %v261_v41 = vadd.f32 %v100_v36, %v99_v35  ;;  %v123_v12 = vld [vmem:[#allocation2 + $0x2e0] sm:$0xff]  ;;  %v129_v27 = vld [vmem:[#allocation2 + $0x310] sm:$0xff]  ;;  %v130_v29 = vld [vmem:[#allocation2 + $0x318] sm:$0xff] }
  0x25   :  { %v297_v22 = vadd.f32 %v124_v13, %v123_v12  ;;  %v127_v30 = vld [vmem:[#allocation2 + $0x300] sm:$0xff]  ;;  %v128_v31 = vld [vmem:[#allocation2 + $0x308] sm:$0xff]  ;;  %v134_v58 = vld [vmem:[#allocation2 + $0x338] sm:$0xff] }
  0x26   :  { %v135_v59 = vld [vmem:[#allocation2 + $0x340] sm:$0xff] }
  0x29   :  { %199 = vadd.xlane.f32.xlu1 %v198_v42  ;;  %v258_v42 = vadd.f32 %v98_v38, %v97_v37 }
  0x2a   :  { %196 = vadd.xlane.f32.xlu0 %v195_v43  ;;  %v264_v43 = vadd.f32 %v102_v40, %v101_v39 }
  0x2b   :  { %202 = vadd.xlane.f32.xlu2 %v201_v44  ;;  %v105_v44 = vld [vmem:[#allocation2 + $0x250] sm:$0xff] }
  0x2c   :  { %v270_v50 = vadd.f32 %v106_v45, %v105_v44  ;;  %v303_v44 = vadd.f32 %v128_v31, %v127_v30  ;;  %v144_v30 = vld [vmem:[#allocation2 + $0x388] sm:$0xff] }
  0x31   :  { %208 = vadd.xlane.f32.xlu1 %v207_v51  ;;  %v267_v51 = vadd.f32 %v104_v47, %v103_v46 }
  0x32   :  { %205 = vadd.xlane.f32.xlu0 %v204_v52  ;;  %v273_v52 = vadd.f32 %v108_v49, %v107_v48 }
  0x33   :  { %211 = vadd.xlane.f32.xlu2 %v210_v53  ;;  %v1654_v53 = vmov 256.0  }
  0x34   :  { %1465 = vrcp.f32 %v1654_v53 }
  0x39   :  { %217 = vadd.xlane.f32.xlu1 %v216_v60  ;;  %v279_v60 = vadd.f32 %v112_v55, %v111_v54  ;;  %v133_v55 = vld [vmem:[#allocation2 + $0x330] sm:$0xff] }
  0x3a   :  { %214 = vadd.xlane.f32.xlu0 %v213_v61  ;;  %v1466_v61 = vpop.eup %1465 }
  0x3b   :  { %220 = vadd.xlane.f32.xlu2 %v219_v62  ;;  %v276_v62 = vadd.f32 %v110_v57, %v109_v56  ;;  %v352_v0 = vmul.f32 256.0, %v1466_v61  ;;  %vm356_vm0 = vweird.f32 %v1466_v61 }
  0x3d   :  { %v353_v8 = vsub.f32 1.0, %v352_v0  ;;  %v137_v0 = vld [vmem:[#allocation2 + $0x350] sm:$0xff] }
  0x3f   :  { %v354_v11 = vmul.f32 %v1466_v61, %v353_v8 }
  0x41   :  { %226 = vadd.xlane.f32.xlu1 %v225_v5  ;;  %v119_v5 = vld [vmem:[#allocation2 + $0x2c0] sm:$0xff]  ;;  %v355_v19 = vadd.f32 %v1466_v61, %v354_v11 }
  0x42   :  { %223 = vadd.xlane.f32.xlu0 %v222_v6  ;;  %v120_v6 = vld [vmem:[#allocation2 + $0x2c8] sm:$0xff] }
  0x43   :  { %229 = vadd.xlane.f32.xlu2 %v228_v7  ;;  %v288_v7 = vadd.f32 %v118_v2, %v117_v1  ;;  %v291_v10 = vadd.f32 %v120_v6, %v119_v5  ;;  %v1682_v26 = vsel %vm356_vm0, %v1466_v61, %v355_v19  ;;  %v138_v1 = vld [vmem:[#allocation2 + $0x358] sm:$0xff]  ;;  %vm658_vm0 = vcmask 1041409  }
  0x49   :  { %235 = vadd.xlane.f32.xlu1 %v234_v14  ;;  %v121_v14 = vld [vmem:[#allocation2 + $0x2d0] sm:$0xff] }
  0x4a   :  { %232 = vadd.xlane.f32.xlu0 %v231_v15  ;;  %v122_v15 = vld [vmem:[#allocation2 + $0x2d8] sm:$0xff] }
  0x4b   :  { %238 = vadd.xlane.f32.xlu2 %v237_v16  ;;  %v125_v16 = vld [vmem:[#allocation2 + $0x2f0] sm:$0xff] }
  0x51   :  { %244 = vadd.xlane.f32.xlu1 %v243_v23  ;;  %v502_v23 = vlaneseq }
  0x52   :  { %241 = vadd.xlane.f32.xlu0 %v240_v24  ;;  %v294_v24 = vadd.f32 %v122_v15, %v121_v14  ;;  %v318_v15 = vadd.f32 %v138_v1, %v137_v0 }
  0x53   :  { %247 = vadd.xlane.f32.xlu2 %v246_v25  ;;  %v300_v25 = vadd.f32 %v126_v17, %v125_v16  ;;  %v1685_v28 = vand.u32 127, %v502_v23 }
  0x55   :  { %v1692_v36 = vadd.s32 4294967272, %v1685_v28  ;;  %v1695_v38 = vadd.s32 4294967288, %v1685_v28  ;;  %v1701_v46 = vadd.s32 4294967256, %v1685_v28  ;;  %v1705_v49 = vadd.s32 4294967264, %v1685_v28 }
  0x56   :  { %v1721_v4 = vadd.s32 4294967248, %v1685_v28  ;;  %v1724_v5 = vadd.s32 4294967232, %v1685_v28  ;;  %v1762_v0 = vadd.s32 4294967184, %v1685_v28 }
  0x59   :  { %253 = vadd.xlane.f32.xlu1 %v252_v32  ;;  %v131_v32 = vld [vmem:[#allocation2 + $0x320] sm:$0xff] }
  0x5a   :  { %250 = vadd.xlane.f32.xlu0 %v249_v33  ;;  %v132_v33 = vld [vmem:[#allocation2 + $0x328] sm:$0xff] }
  0x5b   :  { %256 = vadd.xlane.f32.xlu2 %v255_v34  ;;  %v1688_v34 = vadd.s32 4294967280, %v1685_v28  ;;  %v309_v48 = vadd.f32 %v132_v33, %v131_v32  ;;  %v1741_v33 = vadd.s32 4294967224, %v1685_v28 }
  0x61   :  { %262 = vadd.xlane.f32.xlu1 %v261_v41 }
  0x62   :  { %259 = vadd.xlane.f32.xlu0 %v258_v42 }
  0x63   :  { %265 = vadd.xlane.f32.xlu2 %v264_v43  ;;  %v306_v43 = vadd.f32 %v130_v29, %v129_v27  ;;  %v140_v27 = vld [vmem:[#allocation2 + $0x368] sm:$0xff]  ;;  %v143_v29 = vld [vmem:[#allocation2 + $0x380] sm:$0xff] }
  0x69   :  { %271 = vadd.xlane.f32.xlu1 %v270_v50 }
  0x6a   :  { %268 = vadd.xlane.f32.xlu0 %v267_v51 }
  0x6b   :  { %274 = vadd.xlane.f32.xlu2 %v273_v52 }
  0x71   :  { %280 = vadd.xlane.f32.xlu1 %v279_v60  ;;  %v136_v60 = vld [vmem:[#allocation2 + $0x348] sm:$0xff] }
  0x72   :  { %277 = vadd.xlane.f32.xlu0 %v276_v62  ;;  %v315_v11 = vadd.f32 %v136_v60, %v135_v59  ;;  %v150_v59 = vld [vmem:[#allocation2 + $0x3b8] sm:$0xff] }
  0x73   :  { %283 = vadd.xlane.f32.xlu2 %v282_v63  ;;  %v1717_v63 = vadd.s32 4294967240, %v1685_v28 }
  0x79   :  { %289 = vadd.xlane.f32.xlu1 %v288_v7 }
  0x7a   :  { %286 = vadd.xlane.f32.xlu0 %v285_v9 }
  0x7b   :  { %292 = vadd.xlane.f32.xlu2 %v291_v10  ;;  %v312_v10 = vadd.f32 %v134_v58, %v133_v55  ;;  %v149_v58 = vld [vmem:[#allocation2 + $0x3b0] sm:$0xff] }
  0x7c   :  { %v167_v18 = vpop.xlane.xlu1 %166 }
  0x7d   :  { %v161_v20 = vpop.xlane.xlu0 %160  ;;  %v360_v39 = vmul.f32 %v1682_v26, %v167_v18 }
  0x7e   :  { %v173_v21 = vpop.xlane.xlu2 %172  ;;  %v358_v35 = vmul.f32 %v1682_v26, %v161_v20  ;;  %v139_v20 = vld [vmem:[#allocation2 + $0x360] sm:$0xff] }
  0x7f   :  { %v362_v50 = vmul.f32 %v1682_v26, %v173_v21  ;;  %v510_v54 = vperm.slane %v360_v39, %v1688_v34  ;;  %v141_v21 = vld [vmem:[#allocation2 + $0x370] sm:$0xff] }
  0x80   :  { %v504_v51 = vperm.slane %v358_v35, %v1685_v28  ;;  %v1744_v35 = vadd.s32 4294967208, %v1685_v28 }
  0x81   :  { %298 = vadd.xlane.f32.xlu1 %v297_v22  ;;  %v518_v61 = vperm.slane %v362_v50, %v1705_v49  ;;  %v142_v22 = vld [vmem:[#allocation2 + $0x378] sm:$0xff] }
  0x82   :  { %295 = vadd.xlane.f32.xlu0 %v294_v24 }
  0x83   :  { %301 = vadd.xlane.f32.xlu2 %v300_v25  ;;  %v1737_v25 = vadd.s32 4294967216, %v1685_v28 }
  0x84   :  { %v170_v37 = vpop.xlane.xlu1 %169 }
  0x85   :  { %v361_v40 = vmul.f32 %v1682_v26, %v170_v37  ;;  %v164_v41 = vpop.xlane.xlu0 %163 }
  0x86   :  { %v176_v42 = vpop.xlane.xlu2 %175  ;;  %v359_v45 = vmul.f32 %v1682_v26, %v164_v41  ;;  %v324_v41 = vadd.f32 %v142_v22, %v141_v21  ;;  %v156_v21 = vld [vmem:[#allocation2 + $0x3e8] sm:$0xff] }
  0x87   :  { %v363_v47 = vmul.f32 %v1682_v26, %v176_v42  ;;  %v514_v52 = vperm.slane %v361_v40, %v1692_v36 }
  0x88   :  { %v506_v53 = vperm.slane %v359_v45, %v1695_v38  ;;  %v327_v45 = vadd.f32 %v144_v30, %v143_v29 }
  0x89   :  { %307 = vadd.xlane.f32.xlu1 %v306_v43  ;;  %v522_v57 = vperm.slane %v363_v47, %v1701_v46 }
  0x8a   :  { %v508_v56 = vsel %vm507_vm1, %v506_v53, %v504_v51  ;;  %304 = vadd.xlane.f32.xlu0 %v303_v44  ;;  %v321_v44 = vadd.f32 %v140_v27, %v139_v20  ;;  %v147_v53 = vld [vmem:[#allocation2 + $0x3a0] sm:$0xff]  ;;  %v1774_v27 = vadd.s32 4294967176, %v1685_v28 }
  0x8b   :  { %310 = vadd.xlane.f32.xlu2 %v309_v48  ;;  %v512_v62 = vsel %vm511_vm2, %v510_v54, %v508_v56  ;;  %v148_v54 = vld [vmem:[#allocation2 + $0x3a8] sm:$0xff]  ;;  %v1755_v56 = vadd.s32 4294967192, %v1685_v28  ;;  %v155_v20 = vld [vmem:[#allocation2 + $0x3e0] sm:$0xff] }
  0x8c   :  { %v516_v2 = vsel %vm515_vm3, %v514_v52, %v512_v62  ;;  %v182_v3 = vpop.xlane.xlu1 %181  ;;  %v145_v52 = vld [vmem:[#allocation2 + $0x390] sm:$0xff]  ;;  %v1759_v62 = vadd.s32 4294967200, %v1685_v28 }
  0x8d   :  { %v520_v6 = vsel %vm519_vm4, %v518_v61, %v516_v2  ;;  %v365_v7 = vmul.f32 %v1682_v26, %v182_v3  ;;  %v179_v8 = vpop.xlane.xlu0 %178 }
  0x8e   :  { %v185_v9 = vpop.xlane.xlu2 %184  ;;  %v524_v12 = vsel %vm523_vm5, %v522_v57, %v520_v6  ;;  %v364_v13 = vmul.f32 %v1682_v26, %v179_v8  ;;  %v146_v57 = vld [vmem:[#allocation2 + $0x398] sm:$0xff]  ;;  %v333_v6 = vadd.f32 %v148_v54, %v147_v53 }
  0x8f   :  { %v366_v14 = vmul.f32 %v1682_v26, %v185_v9  ;;  %v530_v16 = vperm.slane %v365_v7, %v1717_v63  ;;  %v330_v9 = vadd.f32 %v146_v57, %v145_v52 }
  0x90   :  { %v526_v17 = vperm.slane %v364_v13, %v1721_v4 }
  0x91   :  { %v534_v18 = vperm.slane %v366_v14, %v1724_v5  ;;  %316 = vadd.xlane.f32.xlu1 %v315_v11 }
  0x92   :  { %v528_v19 = vsel %vm527_vm6, %v526_v17, %v524_v12  ;;  %313 = vadd.xlane.f32.xlu0 %v312_v10  ;;  %v336_v10 = vadd.f32 %v150_v59, %v149_v58  ;;  %v154_v17 = vld [vmem:[#allocation2 + $0x3d8] sm:$0xff] }
  0x93   :  { %319 = vadd.xlane.f32.xlu2 %v318_v15  ;;  %v532_v24 = vsel %vm531_vm7, %v530_v16, %v528_v19  ;;  %v151_v15 = vld [vmem:[#allocation2 + $0x3c0] sm:$0xff]  ;;  %v153_v16 = vld [vmem:[#allocation2 + $0x3d0] sm:$0xff]  ;;  %v152_v19 = vld [vmem:[#allocation2 + $0x3c8] sm:$0xff] }
  0x94   :  { %v536_v31 = vsel %vm535_vm8, %v534_v18, %v532_v24  ;;  %v191_v32 = vpop.xlane.xlu1 %190 }
  0x95   :  { %v368_v37 = vmul.f32 %v1682_v26, %v191_v32  ;;  %v188_v39 = vpop.xlane.xlu0 %187  ;;  %v342_v32 = vadd.f32 %v154_v17, %v153_v16 }
  0x96   :  { %v194_v40 = vpop.xlane.xlu2 %193  ;;  %v367_v42 = vmul.f32 %v1682_v26, %v188_v39 }
  0x97   :  { %v369_v43 = vmul.f32 %v1682_v26, %v194_v40  ;;  %v542_v47 = vperm.slane %v368_v37, %v1737_v25  ;;  %v339_v40 = vadd.f32 %v152_v19, %v151_v15 }
  0x98   :  { %v538_v48 = vperm.slane %v367_v42, %v1741_v33 }
  0x99   :  { %v546_v50 = vperm.slane %v369_v43, %v1744_v35  ;;  %325 = vadd.xlane.f32.xlu1 %v324_v41  ;;  %v345_v41 = vadd.f32 %v156_v21, %v155_v20 }
  0x9a   :  { %v540_v51 = vsel %vm539_vm9, %v538_v48, %v536_v31  ;;  %322 = vadd.xlane.f32.xlu0 %v321_v44  ;;  %v157_v48 = vld [vmem:[#allocation2 + $0x3f0] sm:$0xff] }
  0x9b   :  { %328 = vadd.xlane.f32.xlu2 %v327_v45  ;;  %v544_v55 = vsel %vm543_vm10, %v542_v47, %v540_v51 }
  0x9c   :  { %v548_v60 = vsel %vm547_vm11, %v546_v50, %v544_v55  ;;  %v200_v61 = vpop.xlane.xlu1 %199  ;;  %v158_v50 = vld [vmem:[#allocation2 + $0x3f8] sm:$0xff] }
  0x9d   :  { %v371_v1 = vmul.f32 %v1682_v26, %v200_v61  ;;  %v197_v2 = vpop.xlane.xlu0 %196  ;;  %v348_v58 = vadd.f32 %v158_v50, %v157_v48 }
  0x9e   :  { %v203_v3 = vpop.xlane.xlu2 %202  ;;  %v370_v7 = vmul.f32 %v1682_v26, %v197_v2 }
  0x9f   :  { %v372_v8 = vmul.f32 %v1682_v26, %v203_v3  ;;  %v554_v11 = vperm.slane %v371_v1, %v1755_v56 }
  0xa0   :  { %v550_v12 = vperm.slane %v370_v7, %v1759_v62 }
  0xa1   :  { %v558_v13 = vperm.slane %v372_v8, %v1762_v0  ;;  %334 = vadd.xlane.f32.xlu1 %v333_v6 }
  0xa2   :  { %v552_v14 = vsel %vm551_vm12, %v550_v12, %v548_v60  ;;  %331 = vadd.xlane.f32.xlu0 %v330_v9 }
  0xa3   :  { %337 = vadd.xlane.f32.xlu2 %v336_v10  ;;  %v556_v18 = vsel %vm555_vm13, %v554_v11, %v552_v14 }
  0xa4   :  { %v560_v22 = vsel %vm559_vm14, %v558_v13, %v556_v18  ;;  %v209_v24 = vpop.xlane.xlu1 %208 }
  0xa5   :  { %v374_v29 = vmul.f32 %v1682_v26, %v209_v24  ;;  %v206_v30 = vpop.xlane.xlu0 %205 }
  0xa6   :  { %v212_v31 = vpop.xlane.xlu2 %211  ;;  %v373_v37 = vmul.f32 %v1682_v26, %v206_v30 }
  0xa7   :  { %v375_v39 = vmul.f32 %v1682_v26, %v212_v31  ;;  %v565_v42 = vperm.slane %v374_v29, %v1685_v28 }
  0xa8   :  { %v562_v43 = vperm.slane %v373_v37, %v1774_v27 }
  0xa9   :  { %v566_v44 = vperm.slane %v375_v39, %v1695_v38  ;;  %343 = vadd.xlane.f32.xlu1 %v342_v32 }
  0xaa   :  { %340 = vadd.xlane.f32.xlu0 %v339_v40  ;;  %v1784_v47 = vsel %vm563_vm15, %v562_v43, %v560_v22 }
  0xab   :  { %v567_v45 = vsel %vm507_vm1, %v566_v44, %v565_v42  ;;  %346 = vadd.xlane.f32.xlu2 %v345_v41 }
  0xac   :  { %v218_v51 = vpop.xlane.xlu1 %217 }
  0xad   :  { %v377_v52 = vmul.f32 %v1682_v26, %v218_v51  ;;  %v215_v53 = vpop.xlane.xlu0 %214 }
  0xae   :  { %v221_v54 = vpop.xlane.xlu2 %220  ;;  %v376_v55 = vmul.f32 %v1682_v26, %v215_v53 }
  0xaf   :  { %v378_v57 = vmul.f32 %v1682_v26, %v221_v54  ;;  %v570_v59 = vperm.slane %v377_v52, %v1692_v36 }
  0xb0   :  { %v568_v60 = vperm.slane %v376_v55, %v1688_v34 }
  0xb1   :  { %v572_v61 = vperm.slane %v378_v57, %v1705_v49 }
  0xb2   :  { %v569_v1 = vsel %vm511_vm2, %v568_v60, %v567_v45  ;;  %349 = vadd.xlane.f32.xlu0 %v348_v58 }
  0xb3   :  { %v571_v2 = vsel %vm515_vm3, %v570_v59, %v569_v1 }
  0xb4   :  { %v573_v3 = vsel %vm519_vm4, %v572_v61, %v571_v2  ;;  %v227_v6 = vpop.xlane.xlu1 %226 }
  0xb5   :  { %v380_v7 = vmul.f32 %v1682_v26, %v227_v6  ;;  %v224_v8 = vpop.xlane.xlu0 %223 }
  0xb6   :  { %v230_v9 = vpop.xlane.xlu2 %229  ;;  %v379_v10 = vmul.f32 %v1682_v26, %v224_v8 }
  0xb7   :  { %v381_v11 = vmul.f32 %v1682_v26, %v230_v9  ;;  %v576_v12 = vperm.slane %v380_v7, %v1721_v4 }
  0xb8   :  { %v574_v13 = vperm.slane %v379_v10, %v1701_v46 }
  0xb9   :  { %v578_v14 = vperm.slane %v381_v11, %v1717_v63 }
  0xba   :  { %v575_v15 = vsel %vm523_vm5, %v574_v13, %v573_v3 }
  0xbb   :  { %v577_v16 = vsel %vm527_vm6, %v576_v12, %v575_v15 }
  0xbc   :  { %v579_v17 = vsel %vm531_vm7, %v578_v14, %v577_v16  ;;  %v236_v18 = vpop.xlane.xlu1 %235 }
  0xbd   :  { %v383_v19 = vmul.f32 %v1682_v26, %v236_v18  ;;  %v233_v20 = vpop.xlane.xlu0 %232 }
  0xbe   :  { %v239_v21 = vpop.xlane.xlu2 %238  ;;  %v382_v22 = vmul.f32 %v1682_v26, %v233_v20 }
  0xbf   :  { %v384_v24 = vmul.f32 %v1682_v26, %v239_v21  ;;  %v582_v29 = vperm.slane %v383_v19, %v1741_v33 }
  0xc0   :  { %v580_v30 = vperm.slane %v382_v22, %v1724_v5 }
  0xc1   :  { %v584_v31 = vperm.slane %v384_v24, %v1737_v25 }
  0xc2   :  { %v581_v32 = vsel %vm535_vm8, %v580_v30, %v579_v17 }
  0xc3   :  { %v583_v37 = vsel %vm539_vm9, %v582_v29, %v581_v32 }
  0xc4   :  { %v585_v39 = vsel %vm543_vm10, %v584_v31, %v583_v37  ;;  %v245_v40 = vpop.xlane.xlu1 %244 }
  0xc5   :  { %v386_v41 = vmul.f32 %v1682_v26, %v245_v40  ;;  %v242_v42 = vpop.xlane.xlu0 %241 }
  0xc6   :  { %v248_v43 = vpop.xlane.xlu2 %247  ;;  %v385_v44 = vmul.f32 %v1682_v26, %v242_v42 }
  0xc7   :  { %v387_v45 = vmul.f32 %v1682_v26, %v248_v43  ;;  %v588_v48 = vperm.slane %v386_v41, %v1759_v62 }
  0xc8   :  { %v586_v50 = vperm.slane %v385_v44, %v1744_v35 }
  0xc9   :  { %v590_v51 = vperm.slane %v387_v45, %v1755_v56 }
  0xca   :  { %v587_v52 = vsel %vm547_vm11, %v586_v50, %v585_v39 }
  0xcb   :  { %v589_v53 = vsel %vm551_vm12, %v588_v48, %v587_v52 }
  0xcc   :  { %v591_v54 = vsel %vm555_vm13, %v590_v51, %v589_v53  ;;  %v254_v55 = vpop.xlane.xlu1 %253 }
  0xcd   :  { %v389_v57 = vmul.f32 %v1682_v26, %v254_v55  ;;  %v251_v58 = vpop.xlane.xlu0 %250  ;;  %v437_v55 = vld [vmem:[%s2160_s1 + $0x78] sm:$0xff] }
  0xce   :  { %v257_v59 = vpop.xlane.xlu2 %256  ;;  %v388_v60 = vmul.f32 %v1682_v26, %v251_v58  ;;  %665 = vmatpush.msra.mxu0 %v437_v55 }
  0xcf   :  { %v594_v61 = vperm.slane %v389_v57, %v1774_v27  ;;  %v390_v3 = vmul.f32 %v1682_v26, %v257_v59 }
  0xd0   :  { %v592_v1 = vperm.slane %v388_v60, %v1762_v0 }
  0xd1   :  { %v596_v11 = vperm.slane %v390_v3, %v1685_v28 }
  0xd2   :  { %v593_v2 = vsel %vm559_vm14, %v592_v1, %v591_v54  ;;  %v436_v1 = vld [vmem:[%s2160_s1 + $0x70] sm:$0xff] }
  0xd3   :  { %v595_v6 = vsel %vm563_vm15, %v594_v61, %v593_v2  ;;  %666 = vmatpush.msra.mxu0 %v436_v1  ;;  %v424_v1 = vld [vmem:[%s2160_s1 + $0x10] sm:$0xff] }
  0xd4   :  { %v263_v7 = vpop.xlane.xlu1 %262  ;;  %v1830_v8 = vsel %vm658_vm0, %v595_v6, %v1784_v47  ;;  %v435_v6 = vld [vmem:[%s2160_s1 + $0x68] sm:$0xff]  ;;  %vm660_vm0 = vcmask 1042434  }
  0xd5   :  { %v260_v9 = vpop.xlane.xlu0 %259  ;;  %v392_v14 = vmul.f32 %v1682_v26, %v263_v7  ;;  %667 = vmatpush.msra.mxu0 %v435_v6 }
  0xd6   :  { %v266_v10 = vpop.xlane.xlu2 %265  ;;  %v391_v12 = vmul.f32 %v1682_v26, %v260_v9 }
  0xd7   :  { %v393_v16 = vmul.f32 %v1682_v26, %v266_v10  ;;  %v599_v18 = vperm.slane %v392_v14, %v1688_v34  ;;  %v433_v14 = vld [vmem:[%s2160_s1 + $0x58] sm:$0xff] }
  0xd8   :  { %v597_v13 = vperm.slane %v391_v12, %v1695_v38 }
  0xd9   :  { %v601_v21 = vperm.slane %v393_v16, %v1692_v36 }
  0xda   :  { %v598_v15 = vsel %vm507_vm1, %v597_v13, %v596_v11  ;;  %v434_v11 = vld [vmem:[%s2160_s1 + $0x60] sm:$0xff] }
  0xdb   :  { %v600_v24 = vsel %vm511_vm2, %v599_v18, %v598_v15  ;;  %668 = vmatpush.msra.mxu0 %v434_v11 }
  0xdc   :  { %v272_v17 = vpop.xlane.xlu1 %271  ;;  %v602_v31 = vsel %vm515_vm3, %v601_v21, %v600_v24  ;;  %v432_v21 = vld [vmem:[%s2160_s1 + $0x50] sm:$0xff] }
  0xdd   :  { %v269_v19 = vpop.xlane.xlu0 %268  ;;  %v395_v22 = vmul.f32 %v1682_v26, %v272_v17  ;;  %669 = vmatpush.msra.mxu0 %v433_v14 }
  0xde   :  { %v275_v47 = vpop.xlane.xlu2 %274  ;;  %v394_v20 = vmul.f32 %v1682_v26, %v269_v19 }
  0xdf   :  { %v396_v30 = vmul.f32 %v1682_v26, %v275_v47  ;;  %v605_v32 = vperm.slane %v395_v22, %v1701_v46  ;;  %670 = vmatpush.msra.mxu0 %v432_v21 }
  0xe0   :  { %v603_v29 = vperm.slane %v394_v20, %v1705_v49 }
  0xe1   :  { %v607_v43 = vperm.slane %v396_v30, %v1721_v4  ;;  %v431_v30 = vld [vmem:[%s2160_s1 + $0x48] sm:$0xff] }
  0xe2   :  { %v604_v39 = vsel %vm519_vm4, %v603_v29, %v602_v31  ;;  %671 = vmatpush.msra.mxu0 %v431_v30 }
  0xe3   :  { %v606_v45 = vsel %vm523_vm5, %v605_v32, %v604_v39 }
  0xe4   :  { %v281_v37 = vpop.xlane.xlu1 %280  ;;  %v608_v51 = vsel %vm527_vm6, %v607_v43, %v606_v45 }
  0xe5   :  { %v278_v40 = vpop.xlane.xlu0 %277  ;;  %v398_v44 = vmul.f32 %v1682_v26, %v281_v37  ;;  %v430_v37 = vld [vmem:[%s2160_s1 + $0x40] sm:$0xff] }
  0xe6   :  { %v284_v41 = vpop.xlane.xlu2 %283  ;;  %v397_v42 = vmul.f32 %v1682_v26, %v278_v40  ;;  %672 = vmatpush.msra.mxu0 %v430_v37 }
  0xe7   :  { %v399_v50 = vmul.f32 %v1682_v26, %v284_v41  ;;  %v611_v52 = vperm.slane %v398_v44, %v1724_v5  ;;  %v429_v41 = vld [vmem:[%s2160_s1 + $0x38] sm:$0xff] }
  0xe8   :  { %v609_v48 = vperm.slane %v397_v42, %v1717_v63  ;;  %673 = vmatpush.msra.mxu0 %v429_v41 }
  0xe9   :  { %v613_v59 = vperm.slane %v399_v50, %v1741_v33  ;;  %v427_v50 = vld [vmem:[%s2160_s1 + $0x28] sm:$0xff] }
  0xea   :  { %v610_v53 = vsel %vm531_vm7, %v609_v48, %v608_v51  ;;  %v428_v48 = vld [vmem:[%s2160_s1 + $0x30] sm:$0xff] }
  0xeb   :  { %v612_v2 = vsel %vm535_vm8, %v611_v52, %v610_v53  ;;  %674 = vmatpush.msra.mxu0 %v428_v48  ;;  %v426_v53 = vld [vmem:[%s2160_s1 + $0x20] sm:$0xff] }
  0xec   :  { %v290_v54 = vpop.xlane.xlu1 %289  ;;  %v614_v9 = vsel %vm539_vm9, %v613_v59, %v612_v2  ;;  %v423_v2 = vld [vmem:[%s2160_s1 + $0x8] sm:$0xff] }
  0xed   :  { %v287_v57 = vpop.xlane.xlu0 %286  ;;  %v401_v60 = vmul.f32 %v1682_v26, %v290_v54  ;;  %675 = vmatpush.msra.mxu0 %v427_v50 }
  0xee   :  { %v293_v58 = vpop.xlane.xlu2 %292  ;;  %v400_v61 = vmul.f32 %v1682_v26, %v287_v57 }
  0xef   :  { %v402_v7 = vmul.f32 %v1682_v26, %v293_v58  ;;  %v617_v10 = vperm.slane %v401_v60, %v1744_v35  ;;  %676 = vmatpush.msra.mxu0 %v426_v53 }
  0xf0   :  { %v615_v3 = vperm.slane %v400_v61, %v1737_v25 }
  0xf1   :  { %v619_v15 = vperm.slane %v402_v7, %v1759_v62 }
  0xf2   :  { %v616_v12 = vsel %vm543_vm10, %v615_v3, %v614_v9  ;;  %v422_v3 = vld [vmem:[%s2160_s1] sm:$0xff] }
  0xf3   :  { %v618_v19 = vsel %vm547_vm11, %v617_v10, %v616_v12 }
  0xf4   :  { %v299_v13 = vpop.xlane.xlu1 %298  ;;  %v620_v31 = vsel %vm551_vm12, %v619_v15, %v618_v19 }
  0xf5   :  { %v404_v16 = vmul.f32 %v1682_v26, %v299_v13  ;;  %v296_v17 = vpop.xlane.xlu0 %295 }
  0xf6   :  { %v302_v18 = vpop.xlane.xlu2 %301  ;;  %v403_v47 = vmul.f32 %v1682_v26, %v296_v17 }
  0xf7   :  { %v405_v20 = vmul.f32 %v1682_v26, %v302_v18  ;;  %v623_v22 = vperm.slane %v404_v16, %v1762_v0 }
  0xf8   :  { %v621_v24 = vperm.slane %v403_v47, %v1755_v56 }
  0xf9   :  { %v625_v29 = vperm.slane %v405_v20, %v1774_v27 }
  0xfa   :  { %v622_v32 = vsel %vm555_vm13, %v621_v24, %v620_v31 }
  0xfb   :  { %v624_v39 = vsel %vm559_vm14, %v623_v22, %v622_v32 }
  0xfc   :  { %v308_v40 = vpop.xlane.xlu1 %307  ;;  %v626_v42 = vsel %vm563_vm15, %v625_v29, %v624_v39 }
  0xfd   :  { %v305_v43 = vpop.xlane.xlu0 %304  ;;  %v1906_v45 = vsel %vm660_vm0, %v626_v42, %v1830_v8  ;;  %v407_v51 = vmul.f32 %v1682_v26, %v308_v40  ;;  %v425_v8 = vld [vmem:[%s2160_s1 + $0x18] sm:$0xff] }
  0xfe   :  { %v311_v44 = vpop.xlane.xlu2 %310  ;;  %v406_v52 = vmul.f32 %v1682_v26, %v305_v43  ;;  %677 = vmatpush.msra.mxu0 %v425_v8 }
  0xff   :  { %v408_v55 = vmul.f32 %v1682_v26, %v311_v44  ;;  %v628_v59 = vperm.slane %v407_v51, %v1695_v38 }
 0x100   :  { %v627_v60 = vperm.slane %v406_v52, %v1685_v28  ;;  %678 = vmatpush.msra.mxu0 %v424_v1 }
 0x101   :  { %v630_v6 = vperm.slane %v408_v55, %v1688_v34 }
 0x102   :  { %679 = vmatpush.msra.mxu0 %v423_v2  ;;  %v629_v28 = vsel %vm507_vm1, %v628_v59, %v627_v60  ;;  %vm662_vm1 = vcmask 1043459  }
 0x103   :  { %v631_v11 = vsel %vm511_vm2, %v630_v6, %v629_v28  ;;  %vm687_vm2 = vcmask 64512  }
 0x104   :  { %v317_v54 = vpop.xlane.xlu1 %316  ;;  %680 = vmatpush.msra.mxu0 %v422_v3 }
 0x105   :  { %v314_v57 = vpop.xlane.xlu0 %313  ;;  %v410_v38 = vmul.f32 %v1682_v26, %v317_v54 }
 0x106   :  { %v320_v58 = vpop.xlane.xlu2 %319  ;;  %v409_v61 = vmul.f32 %v1682_v26, %v314_v57 }
 0x107   :  { %v411_v9 = vmul.f32 %v1682_v26, %v320_v58  ;;  %v634_v12 = vperm.slane %v410_v38, %v1705_v49 }
 0x108   :  { %v632_v7 = vperm.slane %v409_v61, %v1692_v36 }
 0x109   :  { %v636_v16 = vperm.slane %v411_v9, %v1701_v46 }
 0x10a   :  { %v633_v15 = vsel %vm515_vm3, %v632_v7, %v631_v11 }
 0x10b   :  { %v635_v36 = vsel %vm519_vm4, %v634_v12, %v633_v15 }
 0x10c   :  { %v326_v10 = vpop.xlane.xlu1 %325  ;;  %v637_v47 = vsel %vm523_vm5, %v636_v16, %v635_v36 }
 0x10d   :  { %v323_v13 = vpop.xlane.xlu0 %322  ;;  %v413_v17 = vmul.f32 %v1682_v26, %v326_v10 }
 0x10e   :  { %v329_v14 = vpop.xlane.xlu2 %328  ;;  %v412_v34 = vmul.f32 %v1682_v26, %v323_v13 }
 0x10f   :  { %v414_v19 = vmul.f32 %v1682_v26, %v329_v14  ;;  %v640_v49 = vperm.slane %v413_v17, %v1717_v63 }
 0x110   :  { %v638_v18 = vperm.slane %v412_v34, %v1721_v4 }
 0x111   :  { %v642_v46 = vperm.slane %v414_v19, %v1724_v5 }
 0x112   :  { %v639_v21 = vsel %vm527_vm6, %v638_v18, %v637_v47 }
 0x113   :  { %v641_v31 = vsel %vm531_vm7, %v640_v49, %v639_v21 }
 0x114   :  { %v335_v20 = vpop.xlane.xlu1 %334  ;;  %v643_v37 = vsel %vm535_vm8, %v642_v46, %v641_v31  ;;  %v1471_v46 = vld [vmem:[#allocation2 + $0x10] sm:$0xff]  ;;  %v1472_v31 = vld [vmem:[#allocation2 + $0x18] sm:$0xff] }
 0x115   :  { %v332_v22 = vpop.xlane.xlu0 %331  ;;  %v416_v30 = vmul.f32 %v1682_v26, %v335_v20 }
 0x116   :  { %v338_v24 = vpop.xlane.xlu2 %337  ;;  %v415_v29 = vmul.f32 %v1682_v26, %v332_v22 }
 0x117   :  { %v417_v32 = vmul.f32 %v1682_v26, %v338_v24  ;;  %v646_v63 = vperm.slane %v416_v30, %v1737_v25 }
 0x118   :  { %v644_v4 = vperm.slane %v415_v29, %v1741_v33 }
 0x119   :  { %v648_v42 = vperm.slane %v417_v32, %v1744_v35 }
 0x11a   :  { %v645_v39 = vsel %vm539_vm9, %v644_v4, %v643_v37 }
 0x11b   :  { %v647_v48 = vsel %vm543_vm10, %v646_v63, %v645_v39  ;;  %v1473_v63 = vld [vmem:[#allocation2 + $0x30] sm:$0xff] }
 0x11c   :  { %v344_v40 = vpop.xlane.xlu1 %343  ;;  %v649_v51 = vsel %vm547_vm11, %v648_v42, %v647_v48 }
 0x11d   :  { %v341_v41 = vpop.xlane.xlu0 %340  ;;  %v419_v43 = vmul.f32 %v1682_v26, %v344_v40  ;;  %v1474_v40 = vld [vmem:[#allocation2 + $0x38] sm:$0xff] }
 0x11e   :  { %v418_v5 = vmul.f32 %v1682_v26, %v341_v41  ;;  %v347_v44 = vpop.xlane.xlu2 %346 }
 0x11f   :  { %v420_v50 = vmul.f32 %v1682_v26, %v347_v44  ;;  %v652_v25 = vperm.slane %v419_v43, %v1755_v56  ;;  %v686_v56 = vld [vmem:[%s2161_s2] sm:$0xff]  ;;  %v1476_v44 = vld [vmem:[#allocation2 + $0x28] sm:$0xff]  ;;  %s1655_s2 = smov [#allocation5]  }
 0x120   :  { %v650_v33 = vperm.slane %v418_v5, %v1759_v62  ;;  %706 = vmatpush.msra.mxu1 %v686_v56  ;;  %v1475_v5 = vld [vmem:[#allocation2 + $0x20] sm:$0xff]  ;;  %v1482_v56 = vld [vmem:[#allocation2 + $0x98] sm:$0xff]  ;;  %s1378_s25 = sshll.u32 %s1655_s2, 4  ;;  %s1379_s25 = int_to_ptr.vmem [resolvable:$true] %s1378_s25 }
 0x121   :  { %v654_v53 = vperm.slane %v420_v50, %v1762_v0  ;;  %v1477_v50 = vld [vmem:[#allocation2] sm:$0xff] }
 0x122   :  { %v651_v52 = vsel %vm551_vm12, %v650_v33, %v649_v51 }
 0x123   :  { %v653_v8 = vsel %vm555_vm13, %v652_v25, %v651_v52  ;;  %v1478_v25 = vld [vmem:[#allocation2 + $0x8] sm:$0xff] }
 0x124   :  { %v655_v62 = vsel %vm559_vm14, %v654_v53, %v653_v8 }
 0x125   :  { %v350_v35 = vpop.xlane.xlu0 %349 }
 0x126   :  { %v421_v54 = vmul.f32 %v1682_v26, %v350_v35  ;;  %v1981_v26 = vshrl.u32 %v502_v23, 7  ;;  %v1479_v35 = vld [vmem:[#allocation2 + $0x50] sm:$0xff] }
 0x128   :  { %v656_v55 = vperm.slane %v421_v54, %v1774_v27  ;;  %1400 = vset.pattern.permute.xlu1 %v1981_v26  ;;  %v1985_v27 = vadd.s32 16, %v1981_v26  ;;  %v1996_v14 = vadd.s32 72, %v1981_v26  ;;  %v1999_v15 = vadd.s32 24, %v1981_v26  ;;  %v1480_v54 = vld [vmem:[#allocation2 + $0x58] sm:$0xff] }
 0x129   :  { %v2002_v34 = vadd.s32 32, %v1981_v26  ;;  %v2008_v16 = vadd.s32 112, %v1981_v26  ;;  %v2011_v17 = vadd.s32 40, %v1981_v26  ;;  %v2014_v36 = vadd.s32 48, %v1981_v26 }
 0x12a   :  { %v657_v57 = vsel %vm563_vm15, %v656_v55, %v655_v62  ;;  %1402 = vset.pattern.permute.xlu0 %v1985_v27  ;;  %v2020_v18 = vadd.s32 56, %v1981_v26  ;;  %v2023_v19 = vadd.s32 64, %v1981_v26  ;;  %v2033_v49 = vadd.s32 80, %v1981_v26 }
 0x12b   :  { %v663_v58 = vsel %vm662_vm1, %v657_v57, %v1906_v45  ;;  %v1988_v45 = vadd.s32 8, %v1981_v26  ;;  %v2036_v20 = vadd.s32 88, %v1981_v26  ;;  %v2043_v21 = vadd.s32 104, %v1981_v26  ;;  %v1481_v57 = vld [vmem:[#allocation2 + $0x90] sm:$0xff] }
 0x12c   :  { %681 = vmatmul.f32.vlgmr.msra.gmra.mxu0 %v663_v58  ;;  %v2046_v22 = vadd.s32 96, %v1981_v26  ;;  %v2053_v24 = vadd.s32 120, %v1981_v26 }
 0x12d   :  { %1401 = vset.pattern.permute.xlu2 %v1988_v45 }
 0x1a9   :  { %v682_v0 = vpop.f32.mrf.mxu0 }
 0x1aa   :  { %v685_v59 = vmax.f32 %v682_v0, 0.0 }
 0x1ac   :  { %1393 = vmatmul.msk.f32.vlgmr.msra.gmra.mxu1 %vm687_vm2, %v685_v59 }
 0x229   :  { %v708_v60 = vpop.f32.mrf.mxu1 }
 0x22a   :  { %v1394_v61 = vmul.f32 -1.442695, %v708_v60  ;;  %v1483_v60 = vld [vmem:[#allocation2 + $0x40] sm:$0xff] }
 0x22c   :  { %1467 = vpow2.f32 %v1394_v61 }
 0x232   :  { %v1468_v1 = vpop.eup %1467 }
 0x233   :  { %v714_v2 = vadd.f32 1.0, %v1468_v1  ;;  %v1484_v1 = vld [vmem:[#allocation2 + $0x48] sm:$0xff] }
 0x235   :  { %1469 = vrcp.f32 %v714_v2  ;;  %v726_v38 = vand.u32 2147483648, %v714_v2  ;;  %v724_v7 = vand.u32 2147483647, %v714_v2  ;;  %vm720_vm4 = vweird.f32 %v714_v2 }
 0x237   :  { %v727_v10 = vor.u32 1.1754944e-38, %v726_v38  ;;  %vm725_vm6 = vcmp.eq.f32.partialorder %v724_v7, 8.507059e+37  ;;  %v1486_v38 = vld [vmem:[#allocation2 + $0x78] sm:$0xff] }
 0x23b   :  { %v1470_v23 = vpop.eup %1469 }
 0x23c   :  { %v716_v3 = vmul.f32 %v1470_v23, %v714_v2  ;;  %vm721_vm3 = vweird.f32 %v1470_v23 }
 0x23d   :  { %vm722_vm5 = vmor %vm720_vm4, %vm721_vm3 }
 0x23e   :  { %v717_v6 = vsub.f32 1.0, %v716_v3  ;;  %v1485_v3 = vld [vmem:[#allocation2 + $0x70] sm:$0xff] }
 0x240   :  { %v718_v28 = vmul.f32 %v1470_v23, %v717_v6 }
 0x242   :  { %v719_v9 = vadd.f32 %v1470_v23, %v718_v28 }
 0x244   :  { %v723_v11 = vsel %vm722_vm5, %v1470_v23, %v719_v9 }
 0x245   :  { %v1992_v12 = vsel %vm725_vm6, %v727_v10, %v723_v11  ;;  %v1487_v10 = vld [vmem:[#allocation2 + $0xe0] sm:$0xff] }
 0x246   :  { %v730_v13 = vperm.slane %v1992_v12, 0  ;;  %v2029_v47 = vperm.slane %v1992_v12, 1  ;;  %v2059_v32 = vperm.slane %v1992_v12, 2  ;;  %v2079_v7 = vperm.slane %v1992_v12, 3 }
 0x248   :  { %747 = vperm.xlu0 %1402, %v730_v13   ;;  %741 = vperm.xlu2 %1401, %v730_v13  }
 0x249   :  { %735 = vperm.xlu1 %1400, %v730_v13  }
 0x250   :  { %1409 = vset.pattern.permute.xlu0 %v1996_v14  ;;  %1403 = vset.pattern.permute.xlu2 %v1999_v15 }
 0x251   :  { %1404 = vset.pattern.permute.xlu1 %v2002_v34 }
 0x258   :  { %789 = vperm.xlu0 %1409, %v730_v13   ;;  %753 = vperm.xlu2 %1403, %v730_v13  }
 0x259   :  { %759 = vperm.xlu1 %1404, %v730_v13  }
 0x260   :  { %1414 = vset.pattern.permute.xlu0 %v2008_v16  ;;  %1405 = vset.pattern.permute.xlu2 %v2011_v17 }
 0x261   :  { %1406 = vset.pattern.permute.xlu1 %v2014_v36 }
 0x268   :  { %819 = vperm.xlu0 %1414, %v730_v13   ;;  %765 = vperm.xlu2 %1405, %v730_v13  }
 0x269   :  { %771 = vperm.xlu1 %1406, %v730_v13  }
 0x270   :  { %1419 = vset.pattern.permute.xlu0 %v1999_v15  ;;  %1407 = vset.pattern.permute.xlu2 %v2020_v18 }
 0x271   :  { %1408 = vset.pattern.permute.xlu1 %v2023_v19 }
 0x278   :  { %850 = vperm.xlu0 %1419, %v2029_v47   ;;  %777 = vperm.xlu2 %1407, %v730_v13  }
 0x279   :  { %783 = vperm.xlu1 %1408, %v730_v13  }
 0x280   :  { %1424 = vset.pattern.permute.xlu0 %v2023_v19  ;;  %1410 = vset.pattern.permute.xlu2 %v2033_v49 }
 0x281   :  { %1411 = vset.pattern.permute.xlu1 %v2036_v20 }
 0x288   :  { %880 = vperm.xlu0 %1424, %v2029_v47   ;;  %795 = vperm.xlu2 %1410, %v730_v13  }
 0x289   :  { %801 = vperm.xlu1 %1411, %v730_v13  }
 0x290   :  { %1429 = vset.pattern.permute.xlu0 %v2043_v21  ;;  %1412 = vset.pattern.permute.xlu2 %v2046_v22 }
 0x291   :  { %1413 = vset.pattern.permute.xlu1 %v2043_v21 }
 0x298   :  { %910 = vperm.xlu0 %1429, %v2029_v47   ;;  %807 = vperm.xlu2 %1412, %v730_v13  }
 0x299   :  { %813 = vperm.xlu1 %1413, %v730_v13  }
 0x2a0   :  { %1434 = vset.pattern.permute.xlu0 %v1985_v27  ;;  %1415 = vset.pattern.permute.xlu2 %v2053_v24 }
 0x2a1   :  { %1416 = vset.pattern.permute.xlu1 %v1981_v26 }
 0x2a2   :  { %v742_v29 = vpop.permute.xlu2 %741 }
 0x2a3   :  { %v1120_v30 = vmul.f32 %v1471_v46, %v742_v29  ;;  %v1121_v4 = vmul.f32 %v1472_v31, %v742_v29 }
 0x2a5   :  { %1248 = vst [vmem:[#allocation5 + $0x10] sm:$0xff] %v1120_v30  ;;  %v1489_v30 = vld [vmem:[#allocation2 + $0x60] sm:$0xff] }
 0x2a6   :  { %1249 = vst [vmem:[#allocation5 + $0x18] sm:$0xff] %v1121_v4  ;;  %v1490_v4 = vld [vmem:[#allocation2 + $0x68] sm:$0xff] }
 0x2a8   :  { %941 = vperm.xlu0 %1434, %v2059_v32   ;;  %825 = vperm.xlu2 %1415, %v730_v13   ;;  %v1488_v13 = vld [vmem:[#allocation2 + $0xe8] sm:$0xff] }
 0x2a9   :  { %832 = vperm.xlu1 %1416, %v2029_v47  }
 0x2b0   :  { %1439 = vset.pattern.permute.xlu0 %v2020_v18  ;;  %1417 = vset.pattern.permute.xlu2 %v1988_v45 }
 0x2b1   :  { %1418 = vset.pattern.permute.xlu1 %v1985_v27 }
 0x2b2   :  { %v754_v37 = vpop.permute.xlu2 %753 }
 0x2b3   :  { %v1124_v39 = vmul.f32 %v1473_v63, %v754_v37  ;;  %v1125_v41 = vmul.f32 %v1474_v40, %v754_v37  ;;  %v1491_v63 = vld [vmem:[#allocation2 + $0xa0] sm:$0xff]  ;;  %v1492_v40 = vld [vmem:[#allocation2 + $0xa8] sm:$0xff] }
 0x2b5   :  { %1252 = vst [vmem:[#allocation5 + $0x30] sm:$0xff] %v1124_v39 }
 0x2b6   :  { %1253 = vst [vmem:[#allocation5 + $0x38] sm:$0xff] %v1125_v41 }
 0x2b8   :  { %971 = vperm.xlu0 %1439, %v2059_v32   ;;  %838 = vperm.xlu2 %1417, %v2029_v47  }
 0x2b9   :  { %844 = vperm.xlu1 %1418, %v2029_v47  }
 0x2ba   :  { %v748_v42 = vpop.permute.xlu0 %747 }
 0x2bb   :  { %v1122_v43 = vmul.f32 %v1475_v5, %v748_v42  ;;  %v1123_v48 = vmul.f32 %v1476_v44, %v748_v42  ;;  %v736_v33 = vpop.permute.xlu1 %735  ;;  %v1493_v5 = vld [vmem:[#allocation2 + $0x130] sm:$0xff]  ;;  %v1494_v44 = vld [vmem:[#allocation2 + $0x138] sm:$0xff] }
 0x2bc   :  { %v1118_v51 = vmul.f32 %v1477_v50, %v736_v33  ;;  %v1119_v52 = vmul.f32 %v1478_v25, %v736_v33  ;;  %v1495_v50 = vld [vmem:[#allocation2 + $0x80] sm:$0xff]  ;;  %v1496_v25 = vld [vmem:[#allocation2 + $0x88] sm:$0xff] }
 0x2bd   :  { %1250 = vst [vmem:[#allocation5 + $0x20] sm:$0xff] %v1122_v43 }
 0x2be   :  { %1251 = vst [vmem:[#allocation5 + $0x28] sm:$0xff] %v1123_v48 }
 0x2bf   :  { %1246 = vst [vmem:[#allocation5] sm:$0xff] %v1118_v51 }
 0x2c0   :  { %1247 = vst [vmem:[#allocation5 + $0x8] sm:$0xff] %v1119_v52  ;;  %1444 = vset.pattern.permute.xlu0 %v2046_v22  ;;  %1420 = vset.pattern.permute.xlu2 %v2002_v34 }
 0x2c1   :  { %1421 = vset.pattern.permute.xlu1 %v2011_v17 }
 0x2c2   :  { %v766_v53 = vpop.permute.xlu2 %765 }
 0x2c3   :  { %v1128_v8 = vmul.f32 %v1479_v35, %v766_v53  ;;  %v1129_v55 = vmul.f32 %v1480_v54, %v766_v53  ;;  %v1497_v35 = vld [vmem:[#allocation2 + $0xc0] sm:$0xff]  ;;  %v1498_v54 = vld [vmem:[#allocation2 + $0xc8] sm:$0xff] }
 0x2c5   :  { %1256 = vst [vmem:[#allocation5 + $0x50] sm:$0xff] %v1128_v8 }
 0x2c6   :  { %1257 = vst [vmem:[#allocation5 + $0x58] sm:$0xff] %v1129_v55 }
 0x2c8   :  { %1001 = vperm.xlu0 %1444, %v2059_v32   ;;  %856 = vperm.xlu2 %1420, %v2029_v47  }
 0x2c9   :  { %862 = vperm.xlu1 %1421, %v2029_v47  }
 0x2ca   :  { %v790_v62 = vpop.permute.xlu0 %789 }
 0x2cb   :  { %v1136_v58 = vmul.f32 %v1481_v57, %v790_v62  ;;  %v1137_v0 = vmul.f32 %v1482_v56, %v790_v62  ;;  %v760_v59 = vpop.permute.xlu1 %759  ;;  %v1499_v57 = vld [vmem:[#allocation2 + $0x180] sm:$0xff]  ;;  %v1500_v56 = vld [vmem:[#allocation2 + $0x188] sm:$0xff] }
 0x2cc   :  { %v1126_v61 = vmul.f32 %v1483_v60, %v760_v59  ;;  %v1127_v2 = vmul.f32 %v1484_v1, %v760_v59  ;;  %v1501_v60 = vld [vmem:[#allocation2 + $0xb0] sm:$0xff]  ;;  %v1502_v1 = vld [vmem:[#allocation2 + $0xb8] sm:$0xff] }
 0x2cd   :  { %1264 = vst [vmem:[#allocation5 + $0x90] sm:$0xff] %v1136_v58 }
 0x2ce   :  { %1265 = vst [vmem:[#allocation5 + $0x98] sm:$0xff] %v1137_v0 }
 0x2cf   :  { %1254 = vst [vmem:[#allocation5 + $0x40] sm:$0xff] %v1126_v61 }
 0x2d0   :  { %1255 = vst [vmem:[#allocation5 + $0x48] sm:$0xff] %v1127_v2  ;;  %1449 = vset.pattern.permute.xlu0 %v1988_v45  ;;  %1422 = vset.pattern.permute.xlu2 %v2014_v36 }
 0x2d1   :  { %1423 = vset.pattern.permute.xlu1 %v2020_v18 }
 0x2d2   :  { %v778_v23 = vpop.permute.xlu2 %777 }
 0x2d3   :  { %v1132_v6 = vmul.f32 %v1485_v3, %v778_v23  ;;  %v1133_v28 = vmul.f32 %v1486_v38, %v778_v23  ;;  %v1503_v3 = vld [vmem:[#allocation2 + $0xf0] sm:$0xff]  ;;  %v1504_v38 = vld [vmem:[#allocation2 + $0xf8] sm:$0xff] }
 0x2d5   :  { %1260 = vst [vmem:[#allocation5 + $0x70] sm:$0xff] %v1132_v6 }
 0x2d6   :  { %1261 = vst [vmem:[#allocation5 + $0x78] sm:$0xff] %v1133_v28 }
 0x2d8   :  { %1032 = vperm.xlu0 %1449, %v2079_v7   ;;  %868 = vperm.xlu2 %1422, %v2029_v47  }
 0x2d9   :  { %874 = vperm.xlu1 %1423, %v2029_v47  }
 0x2da   :  { %v820_v9 = vpop.permute.xlu0 %819 }
 0x2db   :  { %v1146_v11 = vmul.f32 %v1487_v10, %v820_v9  ;;  %v1147_v29 = vmul.f32 %v1488_v13, %v820_v9  ;;  %v772_v46 = vpop.permute.xlu1 %771  ;;  %v1505_v10 = vld [vmem:[#allocation2 + $0x1d0] sm:$0xff]  ;;  %v1506_v13 = vld [vmem:[#allocation2 + $0x1d8] sm:$0xff] }
 0x2dc   :  { %v1130_v31 = vmul.f32 %v1489_v30, %v772_v46  ;;  %v1131_v37 = vmul.f32 %v1490_v4, %v772_v46  ;;  %v1507_v30 = vld [vmem:[#allocation2 + $0xd0] sm:$0xff]  ;;  %v1508_v4 = vld [vmem:[#allocation2 + $0xd8] sm:$0xff] }
 0x2dd   :  { %1274 = vst [vmem:[#allocation5 + $0xe0] sm:$0xff] %v1146_v11 }
 0x2de   :  { %1275 = vst [vmem:[#allocation5 + $0xe8] sm:$0xff] %v1147_v29 }
 0x2df   :  { %1258 = vst [vmem:[#allocation5 + $0x60] sm:$0xff] %v1130_v31 }
 0x2e0   :  { %1259 = vst [vmem:[#allocation5 + $0x68] sm:$0xff] %v1131_v37  ;;  %1454 = vset.pattern.permute.xlu0 %v2014_v36  ;;  %1425 = vset.pattern.permute.xlu2 %v1996_v14 }
 0x2e1   :  { %1426 = vset.pattern.permute.xlu1 %v2033_v49 }
 0x2e2   :  { %v796_v12 = vpop.permute.xlu2 %795 }
 0x2e3   :  { %v1138_v39 = vmul.f32 %v1491_v63, %v796_v12  ;;  %v1139_v41 = vmul.f32 %v1492_v40, %v796_v12 }
 0x2e5   :  { %1266 = vst [vmem:[#allocation5 + $0xa0] sm:$0xff] %v1138_v39  ;;  %v1510_v39 = vld [vmem:[#allocation2 + $0x118] sm:$0xff] }
 0x2e6   :  { %1267 = vst [vmem:[#allocation5 + $0xa8] sm:$0xff] %v1139_v41 }
 0x2e8   :  { %1062 = vperm.xlu0 %1454, %v2079_v7   ;;  %886 = vperm.xlu2 %1425, %v2029_v47  }
 0x2e9   :  { %892 = vperm.xlu1 %1426, %v2029_v47  }
 0x2ea   :  { %v851_v42 = vpop.permute.xlu0 %850 }
 0x2eb   :  { %v1156_v43 = vmul.f32 %v1493_v5, %v851_v42  ;;  %v1157_v48 = vmul.f32 %v1494_v44, %v851_v42  ;;  %v784_v33 = vpop.permute.xlu1 %783  ;;  %v1511_v42 = vld [vmem:[#allocation2 + $0x220] sm:$0xff] }
 0x2ec   :  { %v1134_v51 = vmul.f32 %v1495_v50, %v784_v33  ;;  %v1135_v52 = vmul.f32 %v1496_v25, %v784_v33  ;;  %v1513_v33 = vld [vmem:[#allocation2 + $0x100] sm:$0xff] }
 0x2ed   :  { %1284 = vst [vmem:[#allocation5 + $0x130] sm:$0xff] %v1156_v43  ;;  %v1512_v43 = vld [vmem:[#allocation2 + $0x228] sm:$0xff] }
 0x2ee   :  { %1285 = vst [vmem:[#allocation5 + $0x138] sm:$0xff] %v1157_v48 }
 0x2ef   :  { %1262 = vst [vmem:[#allocation5 + $0x80] sm:$0xff] %v1134_v51 }
 0x2f0   :  { %1263 = vst [vmem:[#allocation5 + $0x88] sm:$0xff] %v1135_v52  ;;  %1459 = vset.pattern.permute.xlu0 %v2036_v20  ;;  %1427 = vset.pattern.permute.xlu2 %v2036_v20  ;;  %v1515_v52 = vld [vmem:[#allocation2 + $0x140] sm:$0xff] }
 0x2f1   :  { %1428 = vset.pattern.permute.xlu1 %v2046_v22 }
 0x2f2   :  { %v808_v53 = vpop.permute.xlu2 %807 }
 0x2f3   :  { %v1142_v8 = vmul.f32 %v1497_v35, %v808_v53  ;;  %v1143_v55 = vmul.f32 %v1498_v54, %v808_v53  ;;  %v1516_v35 = vld [vmem:[#allocation2 + $0x148] sm:$0xff] }
 0x2f5   :  { %1270 = vst [vmem:[#allocation5 + $0xc0] sm:$0xff] %v1142_v8 }
 0x2f6   :  { %1271 = vst [vmem:[#allocation5 + $0xc8] sm:$0xff] %v1143_v55  ;;  %v1517_v55 = vld [vmem:[#allocation2 + $0x270] sm:$0xff] }
 0x2f8   :  { %1092 = vperm.xlu0 %1459, %v2079_v7   ;;  %898 = vperm.xlu2 %1427, %v2029_v47  }
 0x2f9   :  { %904 = vperm.xlu1 %1428, %v2029_v47  }
 0x2fa   :  { %v881_v62 = vpop.permute.xlu0 %880 }
 0x2fb   :  { %v1166_v58 = vmul.f32 %v1499_v57, %v881_v62  ;;  %v1167_v0 = vmul.f32 %v1500_v56, %v881_v62  ;;  %v802_v59 = vpop.permute.xlu1 %801  ;;  %v1518_v57 = vld [vmem:[#allocation2 + $0x278] sm:$0xff] }
 0x2fc   :  { %v1140_v61 = vmul.f32 %v1501_v60, %v802_v59  ;;  %v1141_v2 = vmul.f32 %v1502_v1, %v802_v59  ;;  %v1520_v60 = vld [vmem:[#allocation2 + $0x128] sm:$0xff] }
 0x2fd   :  { %1294 = vst [vmem:[#allocation5 + $0x180] sm:$0xff] %v1166_v58 }
 0x2fe   :  { %1295 = vst [vmem:[#allocation5 + $0x188] sm:$0xff] %v1167_v0  ;;  %v1519_v0 = vld [vmem:[#allocation2 + $0x120] sm:$0xff] }
 0x2ff   :  { %1268 = vst [vmem:[#allocation5 + $0xb0] sm:$0xff] %v1140_v61 }
 0x300   :  { %1269 = vst [vmem:[#allocation5 + $0xb8] sm:$0xff] %v1141_v2  ;;  %1430 = vset.pattern.permute.xlu2 %v2008_v16  ;;  %1464 = vset.pattern.permute.xlu0 %v2053_v24  ;;  %v1521_v2 = vld [vmem:[#allocation2 + $0x160] sm:$0xff] }
 0x301   :  { %1431 = vset.pattern.permute.xlu1 %v2053_v24 }
 0x302   :  { %v826_v23 = vpop.permute.xlu2 %825 }
 0x303   :  { %v1148_v6 = vmul.f32 %v1503_v3, %v826_v23  ;;  %v1149_v28 = vmul.f32 %v1504_v38, %v826_v23  ;;  %v1522_v3 = vld [vmem:[#allocation2 + $0x168] sm:$0xff] }
 0x305   :  { %1276 = vst [vmem:[#allocation5 + $0xf0] sm:$0xff] %v1148_v6 }
 0x306   :  { %1277 = vst [vmem:[#allocation5 + $0xf8] sm:$0xff] %v1149_v28  ;;  %v1523_v28 = vld [vmem:[#allocation2 + $0x2c0] sm:$0xff] }
 0x308   :  { %916 = vperm.xlu2 %1430, %v2029_v47  }
 0x309   :  { %922 = vperm.xlu1 %1431, %v2029_v47   ;;  %v1509_v47 = vld [vmem:[#allocation2 + $0x110] sm:$0xff] }
 0x30a   :  { %v911_v9 = vpop.permute.xlu0 %910 }
 0x30b   :  { %v1176_v11 = vmul.f32 %v1505_v10, %v911_v9  ;;  %v1177_v29 = vmul.f32 %v1506_v13, %v911_v9  ;;  %v814_v46 = vpop.permute.xlu1 %813  ;;  %v1524_v10 = vld [vmem:[#allocation2 + $0x2c8] sm:$0xff] }
 0x30c   :  { %v1144_v31 = vmul.f32 %v1507_v30, %v814_v46  ;;  %v1145_v37 = vmul.f32 %v1508_v4, %v814_v46  ;;  %v1527_v4 = vld [vmem:[#allocation2 + $0x190] sm:$0xff] }
 0x30d   :  { %1304 = vst [vmem:[#allocation5 + $0x1d0] sm:$0xff] %v1176_v11 }
 0x30e   :  { %1305 = vst [vmem:[#allocation5 + $0x1d8] sm:$0xff] %v1177_v29  ;;  %v1525_v29 = vld [vmem:[#allocation2 + $0x150] sm:$0xff] }
 0x30f   :  { %1272 = vst [vmem:[#allocation5 + $0xd0] sm:$0xff] %v1144_v31 }
 0x310   :  { %1273 = vst [vmem:[#allocation5 + $0xd8] sm:$0xff] %v1145_v37  ;;  %1432 = vset.pattern.permute.xlu2 %v1981_v26 }
 0x311   :  { %1433 = vset.pattern.permute.xlu1 %v1988_v45  ;;  %v1514_v45 = vld [vmem:[#allocation2 + $0x108] sm:$0xff] }
 0x312   :  { %v839_v12 = vpop.permute.xlu2 %838 }
 0x313   :  { %v1152_v63 = vmul.f32 %v1509_v47, %v839_v12  ;;  %v1153_v40 = vmul.f32 %v1510_v39, %v839_v12  ;;  %v1528_v12 = vld [vmem:[#allocation2 + $0x198] sm:$0xff]  ;;  %v1529_v39 = vld [vmem:[#allocation2 + $0x310] sm:$0xff] }
 0x315   :  { %1280 = vst [vmem:[#allocation5 + $0x110] sm:$0xff] %v1152_v63 }
 0x316   :  { %1281 = vst [vmem:[#allocation5 + $0x118] sm:$0xff] %v1153_v40 }
 0x318   :  { %929 = vperm.xlu2 %1432, %v2059_v32  }
 0x319   :  { %935 = vperm.xlu1 %1433, %v2059_v32  }
 0x31a   :  { %v942_v41 = vpop.permute.xlu0 %941 }
 0x31b   :  { %v1186_v5 = vmul.f32 %v1511_v42, %v942_v41  ;;  %v1187_v44 = vmul.f32 %v1512_v43, %v942_v41  ;;  %v833_v48 = vpop.permute.xlu1 %832  ;;  %v1530_v41 = vld [vmem:[#allocation2 + $0x318] sm:$0xff]  ;;  %v1531_v43 = vld [vmem:[#allocation2 + $0x170] sm:$0xff] }
 0x31c   :  { %v1150_v50 = vmul.f32 %v1513_v33, %v833_v48  ;;  %v1151_v51 = vmul.f32 %v1514_v45, %v833_v48  ;;  %v1532_v48 = vld [vmem:[#allocation2 + $0x178] sm:$0xff]  ;;  %v1533_v45 = vld [vmem:[#allocation2 + $0x1b0] sm:$0xff] }
 0x31d   :  { %1314 = vst [vmem:[#allocation5 + $0x220] sm:$0xff] %v1186_v5 }
 0x31e   :  { %1315 = vst [vmem:[#allocation5 + $0x228] sm:$0xff] %v1187_v44 }
 0x31f   :  { %1278 = vst [vmem:[#allocation5 + $0x100] sm:$0xff] %v1150_v50 }
 0x320   :  { %1279 = vst [vmem:[#allocation5 + $0x108] sm:$0xff] %v1151_v51  ;;  %1435 = vset.pattern.permute.xlu2 %v1999_v15 }
 0x321   :  { %1436 = vset.pattern.permute.xlu1 %v2002_v34 }
 0x322   :  { %v857_v25 = vpop.permute.xlu2 %856 }
 0x323   :  { %v1158_v53 = vmul.f32 %v1515_v52, %v857_v25  ;;  %v1159_v8 = vmul.f32 %v1516_v35, %v857_v25  ;;  %v1534_v25 = vld [vmem:[#allocation2 + $0x1b8] sm:$0xff]  ;;  %v1535_v35 = vld [vmem:[#allocation2 + $0x360] sm:$0xff] }
 0x325   :  { %1286 = vst [vmem:[#allocation5 + $0x140] sm:$0xff] %v1158_v53 }
 0x326   :  { %1287 = vst [vmem:[#allocation5 + $0x148] sm:$0xff] %v1159_v8 }
 0x328   :  { %947 = vperm.xlu2 %1435, %v2059_v32  }
 0x329   :  { %953 = vperm.xlu1 %1436, %v2059_v32  }
 0x32a   :  { %v972_v54 = vpop.permute.xlu0 %971 }
 0x32b   :  { %v1196_v62 = vmul.f32 %v1517_v55, %v972_v54  ;;  %v1197_v58 = vmul.f32 %v1518_v57, %v972_v54  ;;  %v845_v56 = vpop.permute.xlu1 %844  ;;  %v1536_v54 = vld [vmem:[#allocation2 + $0x368] sm:$0xff]  ;;  %v1537_v57 = vld [vmem:[#allocation2 + $0x1a0] sm:$0xff] }
 0x32c   :  { %v1154_v59 = vmul.f32 %v1519_v0, %v845_v56  ;;  %v1155_v61 = vmul.f32 %v1520_v60, %v845_v56 }
 0x32d   :  { %1324 = vst [vmem:[#allocation5 + $0x270] sm:$0xff] %v1196_v62 }
 0x32e   :  { %1325 = vst [vmem:[#allocation5 + $0x278] sm:$0xff] %v1197_v58 }
 0x32f   :  { %1282 = vst [vmem:[#allocation5 + $0x120] sm:$0xff] %v1154_v59  ;;  %v1539_v59 = vld [vmem:[#allocation2 + $0x1e0] sm:$0xff] }
 0x330   :  { %1283 = vst [vmem:[#allocation5 + $0x128] sm:$0xff] %v1155_v61  ;;  %1437 = vset.pattern.permute.xlu2 %v2011_v17  ;;  %v1540_v61 = vld [vmem:[#allocation2 + $0x1e8] sm:$0xff] }
 0x331   :  { %1438 = vset.pattern.permute.xlu1 %v2014_v36  ;;  %v1526_v36 = vld [vmem:[#allocation2 + $0x158] sm:$0xff] }
 0x332   :  { %v869_v1 = vpop.permute.xlu2 %868 }
 0x333   :  { %v1162_v23 = vmul.f32 %v1521_v2, %v869_v1  ;;  %v1163_v6 = vmul.f32 %v1522_v3, %v869_v1 }
 0x335   :  { %1290 = vst [vmem:[#allocation5 + $0x160] sm:$0xff] %v1162_v23  ;;  %v1541_v23 = vld [vmem:[#allocation2 + $0x3b0] sm:$0xff] }
 0x336   :  { %1291 = vst [vmem:[#allocation5 + $0x168] sm:$0xff] %v1163_v6  ;;  %v1542_v6 = vld [vmem:[#allocation2 + $0x3b8] sm:$0xff] }
 0x338   :  { %959 = vperm.xlu2 %1437, %v2059_v32  }
 0x339   :  { %965 = vperm.xlu1 %1438, %v2059_v32  }
 0x33a   :  { %v1002_v38 = vpop.permute.xlu0 %1001 }
 0x33b   :  { %v1206_v9 = vmul.f32 %v1523_v28, %v1002_v38  ;;  %v1207_v11 = vmul.f32 %v1524_v10, %v1002_v38  ;;  %v863_v13 = vpop.permute.xlu1 %862 }
 0x33c   :  { %v1160_v46 = vmul.f32 %v1525_v29, %v863_v13  ;;  %v1161_v30 = vmul.f32 %v1526_v36, %v863_v13 }
 0x33d   :  { %1334 = vst [vmem:[#allocation5 + $0x2c0] sm:$0xff] %v1206_v9  ;;  %v1543_v9 = vld [vmem:[#allocation2 + $0x1c0] sm:$0xff] }
 0x33e   :  { %1335 = vst [vmem:[#allocation5 + $0x2c8] sm:$0xff] %v1207_v11  ;;  %v1544_v11 = vld [vmem:[#allocation2 + $0x1c8] sm:$0xff] }
 0x33f   :  { %1288 = vst [vmem:[#allocation5 + $0x150] sm:$0xff] %v1160_v46  ;;  %v1545_v46 = vld [vmem:[#allocation2 + $0x200] sm:$0xff] }
 0x340   :  { %1289 = vst [vmem:[#allocation5 + $0x158] sm:$0xff] %v1161_v30  ;;  %1440 = vset.pattern.permute.xlu2 %v2023_v19  ;;  %v1546_v30 = vld [vmem:[#allocation2 + $0x208] sm:$0xff] }
 0x341   :  { %1441 = vset.pattern.permute.xlu1 %v1996_v14 }
 0x342   :  { %v887_v31 = vpop.permute.xlu2 %886 }
 0x343   :  { %v1168_v37 = vmul.f32 %v1527_v4, %v887_v31  ;;  %v1169_v47 = vmul.f32 %v1528_v12, %v887_v31 }
 0x345   :  { %1296 = vst [vmem:[#allocation5 + $0x190] sm:$0xff] %v1168_v37  ;;  %v1547_v37 = vld [vmem:[#allocation2 + $0x1f0] sm:$0xff] }
 0x346   :  { %1297 = vst [vmem:[#allocation5 + $0x198] sm:$0xff] %v1169_v47  ;;  %v1548_v47 = vld [vmem:[#allocation2 + $0x1f8] sm:$0xff] }
 0x348   :  { %977 = vperm.xlu2 %1440, %v2059_v32  }
 0x349   :  { %983 = vperm.xlu1 %1441, %v2059_v32  }
 0x34a   :  { %v1033_v63 = vpop.permute.xlu0 %1032 }
 0x34b   :  { %v1216_v40 = vmul.f32 %v1529_v39, %v1033_v63  ;;  %v1217_v42 = vmul.f32 %v1530_v41, %v1033_v63  ;;  %v875_v5 = vpop.permute.xlu1 %874  ;;  %v1549_v39 = vld [vmem:[#allocation2 + $0x230] sm:$0xff]  ;;  %v1550_v41 = vld [vmem:[#allocation2 + $0x238] sm:$0xff] }
 0x34c   :  { %v1164_v44 = vmul.f32 %v1531_v43, %v875_v5  ;;  %v1165_v33 = vmul.f32 %v1532_v48, %v875_v5  ;;  %v1551_v5 = vld [vmem:[#allocation2 + $0x210] sm:$0xff] }
 0x34d   :  { %1344 = vst [vmem:[#allocation5 + $0x310] sm:$0xff] %v1216_v40 }
 0x34e   :  { %1345 = vst [vmem:[#allocation5 + $0x318] sm:$0xff] %v1217_v42 }
 0x34f   :  { %1292 = vst [vmem:[#allocation5 + $0x170] sm:$0xff] %v1164_v44  ;;  %v1552_v44 = vld [vmem:[#allocation2 + $0x218] sm:$0xff] }
 0x350   :  { %1293 = vst [vmem:[#allocation5 + $0x178] sm:$0xff] %v1165_v33  ;;  %1442 = vset.pattern.permute.xlu2 %v2033_v49 }
 0x351   :  { %1443 = vset.pattern.permute.xlu1 %v2036_v20  ;;  %v1538_v20 = vld [vmem:[#allocation2 + $0x1a8] sm:$0xff] }
 0x352   :  { %v899_v50 = vpop.permute.xlu2 %898 }
 0x353   :  { %v1172_v51 = vmul.f32 %v1533_v45, %v899_v50  ;;  %v1173_v52 = vmul.f32 %v1534_v25, %v899_v50  ;;  %v1554_v50 = vld [vmem:[#allocation2 + $0x258] sm:$0xff]  ;;  %v1555_v25 = vld [vmem:[#allocation2 + $0x240] sm:$0xff] }
 0x355   :  { %1300 = vst [vmem:[#allocation5 + $0x1b0] sm:$0xff] %v1172_v51 }
 0x356   :  { %1301 = vst [vmem:[#allocation5 + $0x1b8] sm:$0xff] %v1173_v52 }
 0x358   :  { %989 = vperm.xlu2 %1442, %v2059_v32  }
 0x359   :  { %995 = vperm.xlu1 %1443, %v2059_v32  }
 0x35a   :  { %v1063_v53 = vpop.permute.xlu0 %1062 }
 0x35b   :  { %v1226_v8 = vmul.f32 %v1535_v35, %v1063_v53  ;;  %v1227_v55 = vmul.f32 %v1536_v54, %v1063_v53  ;;  %v893_v62 = vpop.permute.xlu1 %892  ;;  %v1556_v53 = vld [vmem:[#allocation2 + $0x248] sm:$0xff] }
 0x35c   :  { %v1170_v58 = vmul.f32 %v1537_v57, %v893_v62  ;;  %v1171_v56 = vmul.f32 %v1538_v20, %v893_v62  ;;  %v1558_v54 = vld [vmem:[#allocation2 + $0x288] sm:$0xff]  ;;  %v1559_v57 = vld [vmem:[#allocation2 + $0x260] sm:$0xff] }
 0x35d   :  { %1354 = vst [vmem:[#allocation5 + $0x360] sm:$0xff] %v1226_v8  ;;  %v1560_v20 = vld [vmem:[#allocation2 + $0x268] sm:$0xff] }
 0x35e   :  { %1355 = vst [vmem:[#allocation5 + $0x368] sm:$0xff] %v1227_v55 }
 0x35f   :  { %1298 = vst [vmem:[#allocation5 + $0x1a0] sm:$0xff] %v1170_v58 }
 0x360   :  { %1299 = vst [vmem:[#allocation5 + $0x1a8] sm:$0xff] %v1171_v56  ;;  %1445 = vset.pattern.permute.xlu2 %v2043_v21 }
 0x361   :  { %1446 = vset.pattern.permute.xlu1 %v2008_v16 }
 0x362   :  { %v917_v0 = vpop.permute.xlu2 %916 }
 0x363   :  { %v1178_v60 = vmul.f32 %v1539_v59, %v917_v0  ;;  %v1179_v1 = vmul.f32 %v1540_v61, %v917_v0  ;;  %v1562_v59 = vld [vmem:[#allocation2 + $0x2a8] sm:$0xff] }
 0x365   :  { %1306 = vst [vmem:[#allocation5 + $0x1e0] sm:$0xff] %v1178_v60 }
 0x366   :  { %1307 = vst [vmem:[#allocation5 + $0x1e8] sm:$0xff] %v1179_v1  ;;  %v1563_v1 = vld [vmem:[#allocation2 + $0x290] sm:$0xff] }
 0x368   :  { %1007 = vperm.xlu2 %1445, %v2059_v32  }
 0x369   :  { %1013 = vperm.xlu1 %1446, %v2059_v32  }
 0x36a   :  { %v1093_v2 = vpop.permute.xlu0 %1092 }
 0x36b   :  { %v1236_v3 = vmul.f32 %v1541_v23, %v1093_v2  ;;  %v1237_v38 = vmul.f32 %v1542_v6, %v1093_v2  ;;  %v905_v28 = vpop.permute.xlu1 %904  ;;  %v1564_v23 = vld [vmem:[#allocation2 + $0x298] sm:$0xff] }
 0x36c   :  { %v1174_v10 = vmul.f32 %v1543_v9, %v905_v28  ;;  %v1175_v13 = vmul.f32 %v1544_v11, %v905_v28 }
 0x36d   :  { %1364 = vst [vmem:[#allocation5 + $0x3b0] sm:$0xff] %v1236_v3 }
 0x36e   :  { %1365 = vst [vmem:[#allocation5 + $0x3b8] sm:$0xff] %v1237_v38  ;;  %v1566_v38 = vld [vmem:[#allocation2 + $0x2d8] sm:$0xff] }
 0x36f   :  { %1302 = vst [vmem:[#allocation5 + $0x1c0] sm:$0xff] %v1174_v10  ;;  %v1567_v10 = vld [vmem:[#allocation2 + $0x2b0] sm:$0xff] }
 0x370   :  { %1303 = vst [vmem:[#allocation5 + $0x1c8] sm:$0xff] %v1175_v13  ;;  %1447 = vset.pattern.permute.xlu2 %v2053_v24  ;;  %v1568_v13 = vld [vmem:[#allocation2 + $0x2b8] sm:$0xff] }
 0x371   :  { %1448 = vset.pattern.permute.xlu1 %v1981_v26 }
 0x372   :  { %v930_v29 = vpop.permute.xlu2 %929 }
 0x373   :  { %v1182_v36 = vmul.f32 %v1545_v46, %v930_v29  ;;  %v1183_v31 = vmul.f32 %v1546_v30, %v930_v29 }
 0x375   :  { %1310 = vst [vmem:[#allocation5 + $0x200] sm:$0xff] %v1182_v36  ;;  %v1570_v36 = vld [vmem:[#allocation2 + $0x2f8] sm:$0xff] }
 0x376   :  { %1311 = vst [vmem:[#allocation5 + $0x208] sm:$0xff] %v1183_v31 }
 0x378   :  { %1019 = vperm.xlu2 %1447, %v2059_v32  }
 0x379   :  { %1026 = vperm.xlu1 %1448, %v2079_v7  }
 0x37b   :  { %v923_v4 = vpop.permute.xlu1 %922 }
 0x37c   :  { %v1180_v12 = vmul.f32 %v1547_v37, %v923_v4  ;;  %v1181_v63 = vmul.f32 %v1548_v47, %v923_v4  ;;  %v1571_v4 = vld [vmem:[#allocation2 + $0x2e0] sm:$0xff] }
 0x37e   :  { %1308 = vst [vmem:[#allocation5 + $0x1f0] sm:$0xff] %v1180_v12  ;;  %v1572_v12 = vld [vmem:[#allocation2 + $0x2e8] sm:$0xff] }
 0x37f   :  { %1309 = vst [vmem:[#allocation5 + $0x1f8] sm:$0xff] %v1181_v63 }
 0x380   :  { %1450 = vset.pattern.permute.xlu2 %v1985_v27 }
 0x381   :  { %1451 = vset.pattern.permute.xlu1 %v1999_v15  ;;  %v1553_v15 = vld [vmem:[#allocation2 + $0x250] sm:$0xff] }
 0x382   :  { %v948_v26 = vpop.permute.xlu2 %947 }
 0x383   :  { %v1188_v40 = vmul.f32 %v1549_v39, %v948_v26  ;;  %v1189_v42 = vmul.f32 %v1550_v41, %v948_v26  ;;  %v1574_v26 = vld [vmem:[#allocation2 + $0x328] sm:$0xff]  ;;  %v1575_v41 = vld [vmem:[#allocation2 + $0x300] sm:$0xff] }
 0x385   :  { %1316 = vst [vmem:[#allocation5 + $0x230] sm:$0xff] %v1188_v40 }
 0x386   :  { %1317 = vst [vmem:[#allocation5 + $0x238] sm:$0xff] %v1189_v42 }
 0x388   :  { %1038 = vperm.xlu2 %1450, %v2079_v7  }
 0x389   :  { %1044 = vperm.xlu1 %1451, %v2079_v7  }
 0x38b   :  { %v936_v32 = vpop.permute.xlu1 %935 }
 0x38c   :  { %v1184_v43 = vmul.f32 %v1551_v5, %v936_v32  ;;  %v1185_v48 = vmul.f32 %v1552_v44, %v936_v32  ;;  %v1576_v32 = vld [vmem:[#allocation2 + $0x308] sm:$0xff] }
 0x38e   :  { %1312 = vst [vmem:[#allocation5 + $0x210] sm:$0xff] %v1184_v43  ;;  %v1577_v43 = vld [vmem:[#allocation2 + $0x340] sm:$0xff] }
 0x38f   :  { %1313 = vst [vmem:[#allocation5 + $0x218] sm:$0xff] %v1185_v48  ;;  %v1578_v48 = vld [vmem:[#allocation2 + $0x348] sm:$0xff] }
 0x390   :  { %1452 = vset.pattern.permute.xlu2 %v2002_v34 }
 0x391   :  { %1453 = vset.pattern.permute.xlu1 %v2011_v17  ;;  %v1557_v17 = vld [vmem:[#allocation2 + $0x280] sm:$0xff] }
 0x392   :  { %v960_v27 = vpop.permute.xlu2 %959 }
 0x393   :  { %v1192_v33 = vmul.f32 %v1553_v15, %v960_v27  ;;  %v1193_v45 = vmul.f32 %v1554_v50, %v960_v27 }
 0x395   :  { %1320 = vst [vmem:[#allocation5 + $0x250] sm:$0xff] %v1192_v33  ;;  %v1579_v33 = vld [vmem:[#allocation2 + $0x330] sm:$0xff] }
 0x396   :  { %1321 = vst [vmem:[#allocation5 + $0x258] sm:$0xff] %v1193_v45  ;;  %v1580_v45 = vld [vmem:[#allocation2 + $0x338] sm:$0xff] }
 0x398   :  { %1050 = vperm.xlu2 %1452, %v2079_v7  }
 0x399   :  { %1056 = vperm.xlu1 %1453, %v2079_v7  }
 0x39b   :  { %v954_v51 = vpop.permute.xlu1 %953 }
 0x39c   :  { %v1190_v52 = vmul.f32 %v1555_v25, %v954_v51  ;;  %v1191_v35 = vmul.f32 %v1556_v53, %v954_v51 }
 0x39e   :  { %1318 = vst [vmem:[#allocation5 + $0x240] sm:$0xff] %v1190_v52  ;;  %v1581_v52 = vld [vmem:[#allocation2 + $0x370] sm:$0xff] }
 0x39f   :  { %1319 = vst [vmem:[#allocation5 + $0x248] sm:$0xff] %v1191_v35  ;;  %v1582_v35 = vld [vmem:[#allocation2 + $0x378] sm:$0xff] }
 0x3a0   :  { %1455 = vset.pattern.permute.xlu2 %v2020_v18 }
 0x3a1   :  { %1456 = vset.pattern.permute.xlu1 %v2023_v19  ;;  %v1561_v19 = vld [vmem:[#allocation2 + $0x2a0] sm:$0xff] }
 0x3a2   :  { %v978_v34 = vpop.permute.xlu2 %977 }
 0x3a3   :  { %v1198_v8 = vmul.f32 %v1557_v17, %v978_v34  ;;  %v1199_v55 = vmul.f32 %v1558_v54, %v978_v34 }
 0x3a5   :  { %1326 = vst [vmem:[#allocation5 + $0x280] sm:$0xff] %v1198_v8  ;;  %v1583_v8 = vld [vmem:[#allocation2 + $0x350] sm:$0xff] }
 0x3a6   :  { %1327 = vst [vmem:[#allocation5 + $0x288] sm:$0xff] %v1199_v55  ;;  %v1584_v55 = vld [vmem:[#allocation2 + $0x358] sm:$0xff] }
 0x3a8   :  { %1068 = vperm.xlu2 %1455, %v2079_v7  }
 0x3a9   :  { %1074 = vperm.xlu1 %1456, %v2079_v7  }
 0x3ab   :  { %v966_v62 = vpop.permute.xlu1 %965 }
 0x3ac   :  { %v1194_v58 = vmul.f32 %v1559_v57, %v966_v62  ;;  %v1195_v56 = vmul.f32 %v1560_v20, %v966_v62 }
 0x3ae   :  { %1322 = vst [vmem:[#allocation5 + $0x260] sm:$0xff] %v1194_v58  ;;  %v1585_v58 = vld [vmem:[#allocation2 + $0x390] sm:$0xff] }
 0x3af   :  { %1323 = vst [vmem:[#allocation5 + $0x268] sm:$0xff] %v1195_v56  ;;  %v1586_v56 = vld [vmem:[#allocation2 + $0x398] sm:$0xff] }
 0x3b0   :  { %1457 = vset.pattern.permute.xlu2 %v1996_v14 }
 0x3b1   :  { %1458 = vset.pattern.permute.xlu1 %v2033_v49  ;;  %v1565_v49 = vld [vmem:[#allocation2 + $0x2d0] sm:$0xff] }
 0x3b2   :  { %v990_v18 = vpop.permute.xlu2 %989 }
 0x3b3   :  { %v1202_v0 = vmul.f32 %v1561_v19, %v990_v18  ;;  %v1203_v60 = vmul.f32 %v1562_v59, %v990_v18 }
 0x3b5   :  { %1330 = vst [vmem:[#allocation5 + $0x2a0] sm:$0xff] %v1202_v0  ;;  %v1587_v0 = vld [vmem:[#allocation2 + $0x380] sm:$0xff] }
 0x3b6   :  { %1331 = vst [vmem:[#allocation5 + $0x2a8] sm:$0xff] %v1203_v60  ;;  %v1588_v60 = vld [vmem:[#allocation2 + $0x388] sm:$0xff] }
 0x3b8   :  { %1080 = vperm.xlu2 %1457, %v2079_v7  }
 0x3b9   :  { %1086 = vperm.xlu1 %1458, %v2079_v7  }
 0x3bb   :  { %v984_v61 = vpop.permute.xlu1 %983 }
 0x3bc   :  { %v1200_v2 = vmul.f32 %v1563_v1, %v984_v61  ;;  %v1201_v3 = vmul.f32 %v1564_v23, %v984_v61 }
 0x3be   :  { %1328 = vst [vmem:[#allocation5 + $0x290] sm:$0xff] %v1200_v2  ;;  %v1589_v2 = vld [vmem:[#allocation2 + $0x3c0] sm:$0xff] }
 0x3bf   :  { %1329 = vst [vmem:[#allocation5 + $0x298] sm:$0xff] %v1201_v3  ;;  %v1590_v3 = vld [vmem:[#allocation2 + $0x3c8] sm:$0xff] }
 0x3c0   :  { %1460 = vset.pattern.permute.xlu2 %v2046_v22  ;;  %v1569_v22 = vld [vmem:[#allocation2 + $0x2f0] sm:$0xff] }
 0x3c1   :  { %1461 = vset.pattern.permute.xlu1 %v2043_v21 }
 0x3c2   :  { %v1008_v14 = vpop.permute.xlu2 %1007 }
 0x3c3   :  { %v1208_v6 = vmul.f32 %v1565_v49, %v1008_v14  ;;  %v1209_v28 = vmul.f32 %v1566_v38, %v1008_v14 }
 0x3c5   :  { %1336 = vst [vmem:[#allocation5 + $0x2d0] sm:$0xff] %v1208_v6  ;;  %v1591_v6 = vld [vmem:[#allocation2 + $0x3a0] sm:$0xff] }
 0x3c6   :  { %1337 = vst [vmem:[#allocation5 + $0x2d8] sm:$0xff] %v1209_v28  ;;  %v1592_v28 = vld [vmem:[#allocation2 + $0x3a8] sm:$0xff] }
 0x3c8   :  { %1098 = vperm.xlu2 %1460, %v2079_v7  }
 0x3c9   :  { %1104 = vperm.xlu1 %1461, %v2079_v7  }
 0x3cb   :  { %v996_v9 = vpop.permute.xlu1 %995 }
 0x3cc   :  { %v1204_v11 = vmul.f32 %v1567_v10, %v996_v9  ;;  %v1205_v29 = vmul.f32 %v1568_v13, %v996_v9 }
 0x3ce   :  { %1332 = vst [vmem:[#allocation5 + $0x2b0] sm:$0xff] %v1204_v11  ;;  %v1593_v11 = vld [vmem:[#allocation2 + $0x3e0] sm:$0xff] }
 0x3cf   :  { %1333 = vst [vmem:[#allocation5 + $0x2b8] sm:$0xff] %v1205_v29  ;;  %v1594_v29 = vld [vmem:[#allocation2 + $0x3e8] sm:$0xff] }
 0x3d0   :  { %1462 = vset.pattern.permute.xlu2 %v2008_v16 }
 0x3d1   :  { %1463 = vset.pattern.permute.xlu1 %v2053_v24  ;;  %v1573_v24 = vld [vmem:[#allocation2 + $0x320] sm:$0xff] }
 0x3d2   :  { %v1020_v21 = vpop.permute.xlu2 %1019 }
 0x3d3   :  { %v1212_v46 = vmul.f32 %v1569_v22, %v1020_v21  ;;  %v1213_v30 = vmul.f32 %v1570_v36, %v1020_v21 }
 0x3d5   :  { %1340 = vst [vmem:[#allocation5 + $0x2f0] sm:$0xff] %v1212_v46  ;;  %v1595_v46 = vld [vmem:[#allocation2 + $0x3d0] sm:$0xff] }
 0x3d6   :  { %1341 = vst [vmem:[#allocation5 + $0x2f8] sm:$0xff] %v1213_v30  ;;  %v1596_v30 = vld [vmem:[#allocation2 + $0x3d8] sm:$0xff] }
 0x3d8   :  { %1110 = vperm.xlu2 %1462, %v2079_v7  }
 0x3d9   :  { %1116 = vperm.xlu1 %1463, %v2079_v7  }
 0x3db   :  { %v1014_v31 = vpop.permute.xlu1 %1013 }
 0x3dc   :  { %v1210_v37 = vmul.f32 %v1571_v4, %v1014_v31  ;;  %v1211_v47 = vmul.f32 %v1572_v12, %v1014_v31 }
 0x3de   :  { %1338 = vst [vmem:[#allocation5 + $0x2e0] sm:$0xff] %v1210_v37  ;;  %v1597_v37 = vld [vmem:[#allocation2 + $0x3f0] sm:$0xff] }
 0x3df   :  { %1339 = vst [vmem:[#allocation5 + $0x2e8] sm:$0xff] %v1211_v47  ;;  %v1598_v47 = vld [vmem:[#allocation2 + $0x3f8] sm:$0xff] }
 0x3e2   :  { %v1039_v16 = vpop.permute.xlu2 %1038 }
 0x3e3   :  { %v1218_v63 = vmul.f32 %v1573_v24, %v1039_v16  ;;  %v1219_v39 = vmul.f32 %v1574_v26, %v1039_v16 }
 0x3e5   :  { %1346 = vst [vmem:[#allocation5 + $0x320] sm:$0xff] %v1218_v63 }
 0x3e6   :  { %1347 = vst [vmem:[#allocation5 + $0x328] sm:$0xff] %v1219_v39 }
 0x3eb   :  { %v1027_v40 = vpop.permute.xlu1 %1026 }
 0x3ec   :  { %v1214_v42 = vmul.f32 %v1575_v41, %v1027_v40  ;;  %v1215_v5 = vmul.f32 %v1576_v32, %v1027_v40 }
 0x3ee   :  { %1342 = vst [vmem:[#allocation5 + $0x300] sm:$0xff] %v1214_v42 }
 0x3ef   :  { %1343 = vst [vmem:[#allocation5 + $0x308] sm:$0xff] %v1215_v5 }
 0x3f2   :  { %v1051_v7 = vpop.permute.xlu2 %1050 }
 0x3f3   :  { %v1222_v44 = vmul.f32 %v1577_v43, %v1051_v7  ;;  %v1223_v27 = vmul.f32 %v1578_v48, %v1051_v7 }
 0x3f5   :  { %1350 = vst [vmem:[#allocation5 + $0x340] sm:$0xff] %v1222_v44 }
 0x3f6   :  { %1351 = vst [vmem:[#allocation5 + $0x348] sm:$0xff] %v1223_v27 }
 0x3fb   :  { %v1045_v15 = vpop.permute.xlu1 %1044 }
 0x3fc   :  { %v1220_v50 = vmul.f32 %v1579_v33, %v1045_v15  ;;  %v1221_v51 = vmul.f32 %v1580_v45, %v1045_v15 }
 0x3fe   :  { %1348 = vst [vmem:[#allocation5 + $0x330] sm:$0xff] %v1220_v50 }
 0x3ff   :  { %1349 = vst [vmem:[#allocation5 + $0x338] sm:$0xff] %v1221_v51 }
 0x402   :  { %v1069_v25 = vpop.permute.xlu2 %1068 }
 0x403   :  { %v1228_v53 = vmul.f32 %v1581_v52, %v1069_v25  ;;  %v1229_v34 = vmul.f32 %v1582_v35, %v1069_v25 }
 0x405   :  { %1356 = vst [vmem:[#allocation5 + $0x370] sm:$0xff] %v1228_v53 }
 0x406   :  { %1357 = vst [vmem:[#allocation5 + $0x378] sm:$0xff] %v1229_v34 }
 0x40b   :  { %v1057_v17 = vpop.permute.xlu1 %1056 }
 0x40c   :  { %v1224_v54 = vmul.f32 %v1583_v8, %v1057_v17  ;;  %v1225_v62 = vmul.f32 %v1584_v55, %v1057_v17 }
 0x40e   :  { %1352 = vst [vmem:[#allocation5 + $0x350] sm:$0xff] %v1224_v54 }
 0x40f   :  { %1353 = vst [vmem:[#allocation5 + $0x358] sm:$0xff] %v1225_v62 }
 0x412   :  { %v1081_v57 = vpop.permute.xlu2 %1080 }
 0x413   :  { %v1232_v20 = vmul.f32 %v1585_v58, %v1081_v57  ;;  %v1233_v18 = vmul.f32 %v1586_v56, %v1081_v57 }
 0x415   :  { %1360 = vst [vmem:[#allocation5 + $0x390] sm:$0xff] %v1232_v20 }
 0x416   :  { %1361 = vst [vmem:[#allocation5 + $0x398] sm:$0xff] %v1233_v18 }
 0x41b   :  { %v1075_v19 = vpop.permute.xlu1 %1074 }
 0x41c   :  { %v1230_v59 = vmul.f32 %v1587_v0, %v1075_v19  ;;  %v1231_v61 = vmul.f32 %v1588_v60, %v1075_v19 }
 0x41e   :  { %1358 = vst [vmem:[#allocation5 + $0x380] sm:$0xff] %v1230_v59 }
 0x41f   :  { %1359 = vst [vmem:[#allocation5 + $0x388] sm:$0xff] %v1231_v61 }
 0x422   :  { %v1099_v1 = vpop.permute.xlu2 %1098 }
 0x423   :  { %v1238_v23 = vmul.f32 %v1589_v2, %v1099_v1  ;;  %v1239_v14 = vmul.f32 %v1590_v3, %v1099_v1 }
 0x425   :  { %1366 = vst [vmem:[#allocation5 + $0x3c0] sm:$0xff] %v1238_v23 }
 0x426   :  { %1367 = vst [vmem:[#allocation5 + $0x3c8] sm:$0xff] %v1239_v14 }
 0x42b   :  { %v1087_v49 = vpop.permute.xlu1 %1086 }
 0x42c   :  { %v1234_v38 = vmul.f32 %v1591_v6, %v1087_v49  ;;  %v1235_v9 = vmul.f32 %v1592_v28, %v1087_v49 }
 0x42e   :  { %1362 = vst [vmem:[#allocation5 + $0x3a0] sm:$0xff] %v1234_v38 }
 0x42f   :  { %1363 = vst [vmem:[#allocation5 + $0x3a8] sm:$0xff] %v1235_v9 }
 0x432   :  { %v1111_v10 = vpop.permute.xlu2 %1110 }
 0x433   :  { %v1242_v13 = vmul.f32 %v1593_v11, %v1111_v10  ;;  %v1243_v21 = vmul.f32 %v1594_v29, %v1111_v10 }
 0x435   :  { %1370 = vst [vmem:[#allocation5 + $0x3e0] sm:$0xff] %v1242_v13 }
 0x436   :  { %1371 = vst [vmem:[#allocation5 + $0x3e8] sm:$0xff] %v1243_v21 }
 0x43b   :  { %v1105_v22 = vpop.permute.xlu1 %1104 }
 0x43c   :  { %v1240_v36 = vmul.f32 %v1595_v46, %v1105_v22  ;;  %v1241_v31 = vmul.f32 %v1596_v30, %v1105_v22 }
 0x43e   :  { %1368 = vst [vmem:[#allocation5 + $0x3d0] sm:$0xff] %v1240_v36 }
 0x43f   :  { %1369 = vst [vmem:[#allocation5 + $0x3d8] sm:$0xff] %v1241_v31 }
 0x44b   :  { %v1117_v4 = vpop.permute.xlu1 %1116 }
 0x44c   :  { %v1244_v12 = vmul.f32 %v1597_v37, %v1117_v4  ;;  %v1245_v16 = vmul.f32 %v1598_v47, %v1117_v4 }
 0x44e   :  { %1372 = vst [vmem:[#allocation5 + $0x3f0] sm:$0xff] %v1244_v12 }
 0x44f   :  { %1373 = vst [vmem:[#allocation5 + $0x3f8] sm:$0xff] %v1245_v16 }
 0x450   :  { %1386 = dma.vmem_to_hbm [thread:$0]  %s1379_s25, 16384, %s1381_s28, [#allocation4], %s1652_s17, %s1652_s17, %s1653_s18  }
 0x451   :  { %1649 = dma.done.wait [#allocation4], 16384  }
 0x452   :  { %1650 = vsyncadd [#allocation4], 4294950912 }
 0x453   :  { %1391 = vsyncpa [#allocation3], 1 }
 0x454   :  { %1392 = vsyncpa [#allocation4], 1 }

</bundles_post_ra>
